<compile_context>
chip_gen: v5e
topology: v5e:2x2
jax: 0.10.0
libtpu: 0.0.40
codegen_flags: <defaults>
</compile_context>

<pallas_src>
import functools
import math

import jax
import jax.numpy as jnp
from jax import lax
from jax.experimental import pallas as pl
from jax.experimental.pallas import tpu as pltpu

_INV_SQRT2 = 0.7071067811865476
_SQRT_2_OVER_PI = 0.7978845608028654
_NEG_BIG = -1e30
_LN_EPS = 1e-5


# ---------------------------------------------------------------------------
# tiling / VMEM helpers
# ---------------------------------------------------------------------------
def _pick_tile(n, requested, quantum):
    """Largest multiple of `quantum` <= requested that divides n, else n (full)."""
    req = min(requested, n)
    t = (req // quantum) * quantum
    while t >= quantum:
        if n % t == 0:
            return t
        t -= quantum
    return n


@functools.lru_cache(maxsize=None)
def _vmem_cap_bytes():
    try:
        return int(pltpu.get_tpu_info().vmem_capacity_bytes)
    except Exception:
        return 128 * 1024 * 1024


def _default_th():
    # v7x exposes only 64 MiB of VMEM per TensorCore -> smaller hidden tiles.
    return 256 if _vmem_cap_bytes() <= 96 * 1024 * 1024 else 512


def _vmem_limit(working_set_bytes):
    cap = _vmem_cap_bytes()
    budget = (40 if cap <= 96 * 1024 * 1024 else 48) * 1024 * 1024
    limit = max(2 * working_set_bytes + (4 << 20), 32 << 20)
    return int(min(limit, max(budget, working_set_bytes + (8 << 20))))


def _ln_f32(x, g_ref, b_ref):
    """LayerNorm of a (tm, C) f32 tile with (1, C) weight/bias refs."""
    mu = jnp.mean(x, axis=-1, keepdims=True)
    xc = x - mu
    var = jnp.mean(xc * xc, axis=-1, keepdims=True)
    y = xc * lax.rsqrt(var + _LN_EPS)
    return y * g_ref[...].astype(jnp.float32) + b_ref[...].astype(jnp.float32)


def _rotate_half(x):
    half = x.shape[-1] // 2
    return jnp.concatenate([-x[..., half:], x[..., :half]], axis=-1)


# ---------------------------------------------------------------------------
# LayerNorm + Linear (qkv projection):  y = LN(x) @ W + b
# ---------------------------------------------------------------------------
def _ln_linear_kernel(x_ref, g_ref, bln_ref, w_ref, b_ref, o_ref):
    xn = _ln_f32(x_ref[...].astype(jnp.float32), g_ref, bln_ref)
    y = jnp.dot(xn.astype(w_ref.dtype), w_ref[...], preferred_element_type=jnp.float32)
    o_ref[...] = (y + b_ref[...].astype(jnp.float32)).astype(o_ref.dtype)


def ln_linear_forward(x2, g, bln, w, b, *, tm=256, tn=512):
    M, C = x2.shape
    N = w.shape[1]
    tm_e = _pick_tile(M, tm, 8)
    tn_e = _pick_tile(N, tn, 128)
    isz = x2.dtype.itemsize
    ws = (2 * (tm_e * C + C * tn_e + tn_e + tm_e * tn_e) * isz
          + tm_e * (C + tn_e) * 4 + 2 * C * isz)
    return pl.pallas_call(
        _ln_linear_kernel,
        out_shape=jax.ShapeDtypeStruct((M, N), x2.dtype),
        grid_spec=pltpu.PrefetchScalarGridSpec(
            num_scalar_prefetch=0,
            grid=(M // tm_e, N // tn_e),
            in_specs=[
                pl.BlockSpec((tm_e, C), lambda i, j: (i, 0)),
                pl.BlockSpec((1, C), lambda i, j: (0, 0)),
                pl.BlockSpec((1, C), lambda i, j: (0, 0)),
                pl.BlockSpec((C, tn_e), lambda i, j: (0, j)),
                pl.BlockSpec((1, tn_e), lambda i, j: (0, j)),
            ],
            out_specs=pl.BlockSpec((tm_e, tn_e), lambda i, j: (i, j)),
        ),
        compiler_params=pltpu.CompilerParams(
            dimension_semantics=("parallel", "parallel"),
            vmem_limit_bytes=_vmem_limit(ws)),
    )(x2, g.reshape(1, C), bln.reshape(1, C), w, b.reshape(1, N))


# ---------------------------------------------------------------------------
# Flash attention core with fused RoPE, in-kernel causal mask and attn-sink.
# q/k/v are read from a single (3, nH, B, T, D) array via three BlockSpecs;
# output is written head-major (nH, B, T, D) so c_proj needs no transpose.
# ---------------------------------------------------------------------------
def _flash_attn_kernel(q_ref, k_ref, v_ref, cq_ref, sq_ref, ck_ref, sk_ref, *rest,
                       scale, causal, has_mask, attn_sink, tq, tkv):
    if has_mask:
        mask_ref, o_ref, m_scr, l_scr, acc_scr = rest
    else:
        mask_ref = None
        o_ref, m_scr, l_scr, acc_scr = rest

    qi = pl.program_id(2)
    ki = pl.program_id(3)

    @pl.when(ki == 0)
    def _init():
        m_scr[...] = jnp.full_like(m_scr, _NEG_BIG)
        l_scr[...] = jnp.zeros_like(l_scr)
        acc_scr[...] = jnp.zeros_like(acc_scr)

    def _update():
        qf = q_ref[...].astype(jnp.float32)
        kf = k_ref[...].astype(jnp.float32)
        # RoPE fused on the already-loaded tiles (VPU work hidden under MXU).
        q_rot = qf * cq_ref[...] + _rotate_half(qf) * sq_ref[...]
        k_rot = kf * ck_ref[...] + _rotate_half(kf) * sk_ref[...]
        s = lax.dot_general(q_rot.astype(q_ref.dtype), k_rot.astype(k_ref.dtype),
                            dimension_numbers=(((1,), (1,)), ((), ())),
                            preferred_element_type=jnp.float32)
        s = s * scale
        if has_mask:
            s = s + mask_ref[...]
        if causal:
            rows = qi * tq + lax.broadcasted_iota(jnp.int32, (tq, tkv), 0)
            cols = ki * tkv + lax.broadcasted_iota(jnp.int32, (tq, tkv), 1)
            s = jnp.where(rows >= cols, s, _NEG_BIG)
        m_prev = m_scr[...]
        m_new = jnp.maximum(m_prev, jnp.max(s, axis=-1, keepdims=True))
        alpha = jnp.exp(m_prev - m_new)
        p = jnp.exp(s - m_new)
        l_scr[...] = alpha * l_scr[...] + jnp.sum(p, axis=-1, keepdims=True)
        acc_scr[...] = alpha * acc_scr[...] + jnp.dot(
            p.astype(v_ref.dtype), v_ref[...], preferred_element_type=jnp.float32)
        m_scr[...] = m_new

    if causal:
        # Skip KV blocks that are entirely in the future of this q tile.
        @pl.when(ki * tkv <= qi * tq + (tq - 1))
        def _():
            _update()
    else:
        _update()

    @pl.when(ki == pl.num_programs(3) - 1)
    def _finalize():
        l = l_scr[...]
        if attn_sink:
            # Appending a zero logit and dropping its column only changes the
            # denominator: + exp(0 - m) relative to the running max m.
            l = l + jnp.exp(-m_scr[...])
        o_ref[...] = (acc_scr[...] * pl.reciprocal(l, approx=True)).astype(o_ref.dtype)
        # TODO(synk): attn_dropout is identity for dropout=0 / eval mode.
        # Note: a row with no valid keys yields uniform weights (ref gives NaN);
        # never hit by causal masks.


def flash_attention(qkvh, cos, sin, *, mask_add=None, causal=False,
                    attn_sink=False, tq=256, tkv=256):
    """qkvh: (3, nH, B, T, D); cos/sin: (T, D) f32; returns (nH, B, T, D)."""
    three, nH, B, T, D = qkvh.shape
    assert three == 3
    S = T
    has_mask = mask_add is not None
    tq_e = _pick_tile(T, tq, 8)
    tkv_e = _pick_tile(S, tkv, 128 if has_mask else 8)

    kernel = functools.partial(
        _flash_attn_kernel, scale=1.0 / math.sqrt(D), causal=causal,
        has_mask=has_mask, attn_sink=attn_sink, tq=tq_e, tkv=tkv_e)

    in_specs = [
        pl.BlockSpec((None, None, None, tq_e, D), lambda b, h, qi, ki: (0, h, b, qi, 0)),
        pl.BlockSpec((None, None, None, tkv_e, D), lambda b, h, qi, ki: (1, h, b, ki, 0)),
        pl.BlockSpec((None, None, None, tkv_e, D), lambda b, h, qi, ki: (2, h, b, ki, 0)),
        pl.BlockSpec((tq_e, D), lambda b, h, qi, ki: (qi, 0)),   # cos for q
        pl.BlockSpec((tq_e, D), lambda b, h, qi, ki: (qi, 0)),   # sin for q
        pl.BlockSpec((tkv_e, D), lambda b, h, qi, ki: (ki, 0)),  # cos for k
        pl.BlockSpec((tkv_e, D), lambda b, h, qi, ki: (ki, 0)),  # sin for k
    ]
    args = [qkvh, qkvh, qkvh, cos, sin, cos, sin]
    if has_mask:
        in_specs.append(pl.BlockSpec((None, None, tq_e, tkv_e),
                                     lambda b, h, qi, ki: (b, 0, qi, ki)))
        args.append(mask_add)

    isz = qkvh.dtype.itemsize
    ws = (2 * ((tq_e + 2 * tkv_e) * D * isz + 2 * (tq_e + tkv_e) * D * 4
               + tq_e * D * isz)
          + 4 * tq_e * tkv_e * 4 + tq_e * (D + 2) * 4
          + (2 * tq_e * tkv_e * 4 if has_mask else 0))
    cost = pl.CostEstimate(
        flops=int(4 * B * nH * T * S * D),
        transcendentals=int(B * nH * T * S),
        bytes_accessed=int(isz * (2 * B * nH * T * D
                                  + 2 * B * nH * S * D * (T // tq_e))))

    return pl.pallas_call(
        kernel,
        out_shape=jax.ShapeDtypeStruct((nH, B, T, D), qkvh.dtype),
        grid_spec=pltpu.PrefetchScalarGridSpec(
            num_scalar_prefetch=0,
            grid=(B, nH, T // tq_e, S // tkv_e),
            in_specs=in_specs,
            out_specs=pl.BlockSpec((None, None, tq_e, D),
                                   lambda b, h, qi, ki: (h, b, qi, 0)),
            scratch_shapes=[pltpu.VMEM((tq_e, 1), jnp.float32),
                            pltpu.VMEM((tq_e, 1), jnp.float32),
                            pltpu.VMEM((tq_e, D), jnp.float32)]),
        compiler_params=pltpu.CompilerParams(
            dimension_semantics=("parallel", "parallel", "parallel", "arbitrary"),
            vmem_limit_bytes=_vmem_limit(ws)),
        cost_estimate=cost,
    )(*args)


# ---------------------------------------------------------------------------
# Attention output projection as a head-reduction matmul, residual fused.
#   out = sum_h y[h] @ W_o[h*D:(h+1)*D, :] + b_o + residual
# ---------------------------------------------------------------------------
def _attn_proj_kernel(y_ref, w_ref, b_ref, res_ref, o_ref, acc_ref):
    k = pl.program_id(1)

    @pl.when(k == 0)
    def _init():
        acc_ref[...] = jnp.zeros_like(acc_ref)

    acc_ref[...] += jnp.dot(y_ref[...], w_ref[...], preferred_element_type=jnp.float32)

    @pl.when(k == pl.num_programs(1) - 1)
    def _fin():
        o_ref[...] = (acc_ref[...] + b_ref[...].astype(jnp.float32)
                      + res_ref[...].astype(jnp.float32)).astype(o_ref.dtype)
        # TODO(synk): resid_dropout is identity for dropout=0 / eval mode.


def attn_out_proj_forward(y_heads, w_o, b_o, residual, *, tm=256):
    """y_heads: (nH, M, D); w_o: (C, C) input-major; residual: (M, C)."""
    nH, M, D = y_heads.shape
    C = w_o.shape[1]
    tm_e = _pick_tile(M, tm, 8)
    w_r = w_o.reshape(nH, D, C)   # free reshape; head h's rows of W_o
    isz = y_heads.dtype.itemsize
    ws = 2 * (tm_e * D + D * C + tm_e * C) * isz + tm_e * C * (isz + 4) + C * 4
    return pl.pallas_call(
        _attn_proj_kernel,
        out_shape=jax.ShapeDtypeStruct((M, C), residual.dtype),
        grid_spec=pltpu.PrefetchScalarGridSpec(
            num_scalar_prefetch=0,
            grid=(M // tm_e, nH),
            in_specs=[
                pl.BlockSpec((None, tm_e, D), lambda i, k: (k, i, 0)),
                pl.BlockSpec((None, D, C), lambda i, k: (k, 0, 0)),
                pl.BlockSpec((1, C), lambda i, k: (0, 0)),
                pl.BlockSpec((tm_e, C), lambda i, k: (i, 0)),
            ],
            out_specs=pl.BlockSpec((tm_e, C), lambda i, k: (i, 0)),
            scratch_shapes=[pltpu.VMEM((tm_e, C), jnp.float32)]),
        compiler_params=pltpu.CompilerParams(
            dimension_semantics=("parallel", "arbitrary"),
            vmem_limit_bytes=_vmem_limit(ws)),
    )(y_heads, w_r, b_o.reshape(1, C), residual)


# ---------------------------------------------------------------------------
# Fused MLP block: residual + GELU(LN(x) @ W1 + b1) @ W2 + b2, hidden tiled.
# ---------------------------------------------------------------------------
def _mlp_kernel(x_ref, g_ref, bln_ref, w1_ref, b1_ref, w2_ref, b2_ref, o_ref,
                acc_ref, *, approximate_gelu):
    j = pl.program_id(1)

    @pl.when(j == 0)
    def _init():
        acc_ref[...] = jnp.zeros_like(acc_ref)

    x = x_ref[...].astype(jnp.float32)
    xn = _ln_f32(x, g_ref, bln_ref)          # LN prologue, recomputed per hidden tile (VPU)
    h = jnp.dot(xn.astype(w1_ref.dtype), w1_ref[...], preferred_element_type=jnp.float32)
    h = h + b1_ref[...].astype(jnp.float32)
    if approximate_gelu:
        h = 0.5 * h * (1.0 + jnp.tanh(_SQRT_2_OVER_PI * (h + 0.044715 * h * h * h)))
    else:
        h = 0.5 * h * (1.0 + lax.erf(h * _INV_SQRT2))   # exact, matches torch.nn.GELU()
    acc_ref[...] += jnp.dot(h.astype(w2_ref.dtype), w2_ref[...],
                            preferred_element_type=jnp.float32)

    @pl.when(j == pl.num_programs(1) - 1)
    def _fin():
        # c_proj bias + residual fused into the finalize (once per output tile).
        o_ref[...] = (acc_ref[...] + b2_ref[...].astype(jnp.float32)
                      + x_ref[...].astype(jnp.float32)).astype(o_ref.dtype)
        # TODO(synk): nn.Dropout is identity for dropout=0 / eval mode.


def mlp_block_forward(x2, g, bln, w_fc, b_fc, w_proj, b_proj, *, tm=256, th=None,
                      approximate_gelu=False):
    M, C = x2.shape
    H = w_fc.shape[1]
    if th is None:
        th = _default_th()
    tm_e = _pick_tile(M, tm, 8)
    th_e = _pick_tile(H, th, 128)
    isz = x2.dtype.itemsize
    ws = (2 * (tm_e * C + C * th_e + th_e + th_e * C + tm_e * C) * isz
          + tm_e * C * 4 + 3 * tm_e * th_e * 4 + 2 * C * isz)
    cost = pl.CostEstimate(
        flops=int(4 * M * C * H),
        transcendentals=int(M * H),
        bytes_accessed=int((x2.size + w_fc.size + w_proj.size + H + C + M * C) * isz))
    return pl.pallas_call(
        functools.partial(_mlp_kernel, approximate_gelu=approximate_gelu),
        out_shape=jax.ShapeDtypeStruct((M, C), x2.dtype),
        grid_spec=pltpu.PrefetchScalarGridSpec(
            num_scalar_prefetch=0,
            grid=(M // tm_e, H // th_e),            # hidden (reduction) axis last
            in_specs=[
                pl.BlockSpec((tm_e, C), lambda i, j: (i, 0)),
                pl.BlockSpec((1, C), lambda i, j: (0, 0)),
                pl.BlockSpec((1, C), lambda i, j: (0, 0)),
                pl.BlockSpec((C, th_e), lambda i, j: (0, j)),
                pl.BlockSpec((1, th_e), lambda i, j: (0, j)),
                pl.BlockSpec((th_e, C), lambda i, j: (j, 0)),
                pl.BlockSpec((1, C), lambda i, j: (0, 0)),
            ],
            out_specs=pl.BlockSpec((tm_e, C), lambda i, j: (i, 0)),
            scratch_shapes=[pltpu.VMEM((tm_e, C), jnp.float32)]),
        compiler_params=pltpu.CompilerParams(
            dimension_semantics=("parallel", "arbitrary"),
            vmem_limit_bytes=_vmem_limit(ws)),
        cost_estimate=cost,
    )(x2, g.reshape(1, C), bln.reshape(1, C), w_fc, b_fc.reshape(1, H),
      w_proj, b_proj.reshape(1, C))


# ---------------------------------------------------------------------------
# Final LayerNorm (standalone; its output is the module output)
# ---------------------------------------------------------------------------
def _ln_kernel(x_ref, w_ref, b_ref, o_ref):
    o_ref[...] = _ln_f32(x_ref[...].astype(jnp.float32), w_ref, b_ref).astype(o_ref.dtype)


def layernorm_forward(x2, w, b, *, tm=256):
    M, C = x2.shape
    tm_e = _pick_tile(M, tm, 8)
    return pl.pallas_call(
        _ln_kernel,
        out_shape=jax.ShapeDtypeStruct((M, C), x2.dtype),
        grid_spec=pltpu.PrefetchScalarGridSpec(
            num_scalar_prefetch=0,
            grid=(M // tm_e,),
            in_specs=[
                pl.BlockSpec((tm_e, C), lambda i: (i, 0)),
                pl.BlockSpec((1, C), lambda i: (0, 0)),
                pl.BlockSpec((1, C), lambda i: (0, 0)),
            ],
            out_specs=pl.BlockSpec((tm_e, C), lambda i: (i, 0)),
        ),
        compiler_params=pltpu.CompilerParams(dimension_semantics=("parallel",)),
    )(x2, w.reshape(1, C), b.reshape(1, C))


# ---------------------------------------------------------------------------
# Rotary tables (the PyTorch `rotary` module is injected externally; the
# standard half-rotation RoPE is used here and in the reference)
# ---------------------------------------------------------------------------
def _rope_tables(T, D, base=10000.0):
    half = D // 2
    inv_freq = base ** (-jnp.arange(half, dtype=jnp.float32) / half)
    freqs = jnp.arange(T, dtype=jnp.float32)[:, None] * inv_freq[None, :]
    emb = jnp.concatenate([freqs, freqs], axis=-1)
    return jnp.cos(emb), jnp.sin(emb)


def _apply_rope(x, cos, sin):
    half = x.shape[-1] // 2
    x1, x2 = x[..., :half], x[..., half:]
    return x * cos + jnp.concatenate([-x2, x1], axis=-1) * sin


# ---------------------------------------------------------------------------
# Transformer forward
# ---------------------------------------------------------------------------
def transformer_forward(x, params, mask=None, *, n_head, causal=False,
                        attn_sink=False, stack_enc_dec=False,
                        tm=256, tn=512, th=None, tq=256, tkv=256,
                        approximate_gelu=False):
    """Forward pass of `Transformer` (self-attention layers, dropout=0).

    mask: optional boolean mask broadcastable to (B, 1, T, T) (True = keep).
    causal=True generates the causal mask inside the attention kernel (no HBM
    mask).  TODO(synk): cross-attention / mems path (self_attention=False,
    c_attn_mem) is not implemented.
    """
    B, T, C = x.shape
    D = C // n_head
    M = B * T
    cos, sin = _rope_tables(T, D)

    mask_add = None
    if mask is not None:
        mask_b = jnp.broadcast_to(mask, (B, 1, T, T))
        mask_add = jnp.where(mask_b, 0.0, _NEG_BIG).astype(jnp.float32)

    x2 = x.reshape(M, C)
    new_mems = []
    for lp in params["layers"]:
        # --- attention branch: LN fused into qkv linear, RoPE + mask fused in
        # the flash kernel, residual fused into the head-reduction c_proj.
        qkv = ln_linear_forward(x2, lp["ln_1_w"], lp["ln_1_b"],
                                lp["w_attn"], lp["b_attn"], tm=tm, tn=tn)
        qkvh = qkv.reshape(B, T, 3, n_head, D).transpose(2, 3, 0, 1, 4)
        y = flash_attention(qkvh, cos, sin, mask_add=mask_add, causal=causal,
                            attn_sink=attn_sink, tq=tq, tkv=tkv)
        x2 = attn_out_proj_forward(y.reshape(n_head, M, D), lp["w_o"], lp["b_o"],
                                   x2, tm=tm)
        # --- MLP branch: LN + GELU + residual fused, hidden dim tiled.
        x2 = mlp_block_forward(x2, lp["ln_2_w"], lp["ln_2_b"], lp["w_fc"],
                               lp["b_fc"], lp["w_proj2"], lp["b_proj2"],
                               tm=tm, th=th, approximate_gelu=approximate_gelu)
        if not stack_enc_dec:
            new_mems.append(x2.reshape(B, T, C))

    out = layernorm_forward(x2, params["ln_f_w"], params["ln_f_b"], tm=tm)
    out = out.reshape(B, T, C)
    if stack_enc_dec:
        new_mems = [out] * len(params["layers"])
    return out, new_mems


# ---------------------------------------------------------------------------
# Pure-JAX reference (mirrors the PyTorch module, dropout=0)
# ---------------------------------------------------------------------------
def _ref_layernorm(x, w, b):
    mu = jnp.mean(x, axis=-1, keepdims=True)
    var = jnp.mean((x - mu) ** 2, axis=-1, keepdims=True)
    return (x - mu) / jnp.sqrt(var + _LN_EPS) * w + b


def _ref_mlp(x, lp):
    B, T, C = x.shape
    h = x.reshape(-1, C) @ lp["w_fc"] + lp["b_fc"]
    h = 0.5 * h * (1.0 + lax.erf(h / jnp.sqrt(2.0)))
    return (h @ lp["w_proj2"] + lp["b_proj2"]).reshape(B, T, C)


def _ref_attention(x, lp, mask_bool, cos, sin, n_head, attn_sink):
    B, T, C = x.shape
    D = C // n_head
    qkv = (x.reshape(-1, C) @ lp["w_attn"] + lp["b_attn"]).reshape(B, T, 3 * C)
    q, k, v = qkv[..., :C], qkv[..., C:2 * C], qkv[..., 2 * C:]

    def heads(t):
        return t.reshape(B, T, n_head, D).transpose(0, 2, 1, 3)

    q, k, v = heads(q), heads(k), heads(v)
    q, k = _apply_rope(q, cos, sin), _apply_rope(k, cos, sin)
    s = jnp.einsum("bhtd,bhsd->bhts", q, k) / math.sqrt(D)
    s = jnp.where(mask_bool, s, -jnp.inf)
    if attn_sink:
        s = jnp.concatenate([s, jnp.zeros(s.shape[:-1] + (1,), s.dtype)], axis=-1)
        p = jax.nn.softmax(s, axis=-1)[..., :-1]
    else:
        p = jax.nn.softmax(s, axis=-1)
    y = jnp.einsum("bhts,bhsd->bhtd", p, v)
    y = y.transpose(0, 2, 1, 3).reshape(-1, C) @ lp["w_o"] + lp["b_o"]
    return y.reshape(B, T, C)


def _ref_transformer(x, params, mask_bool, n_head, attn_sink, stack_enc_dec):
    T, C = x.shape[1], x.shape[2]
    cos, sin = _rope_tables(T, C // n_head)
    new_mems = []
    for lp in params["layers"]:
        x = x + _ref_attention(_ref_layernorm(x, lp["ln_1_w"], lp["ln_1_b"]),
                               lp, mask_bool, cos, sin, n_head, attn_sink)
        x = x + _ref_mlp(_ref_layernorm(x, lp["ln_2_w"], lp["ln_2_b"]), lp)
        if not stack_enc_dec:
            new_mems.append(x)
    x = _ref_layernorm(x, params["ln_f_w"], params["ln_f_b"])
    if stack_enc_dec:
        new_mems = [x] * len(params["layers"])
    return x, new_mems


# ---------------------------------------------------------------------------
# Parameter init (nn.Linear-style uniform +-1/sqrt(fan_in); LN weight=1, bias=0)
# ---------------------------------------------------------------------------
def _linear_init(key, fan_in, fan_out):
    kw, kb = jax.random.split(key)
    bound = 1.0 / math.sqrt(fan_in)
    w = jax.random.uniform(kw, (fan_in, fan_out), jnp.float32, -bound, bound)
    b = jax.random.uniform(kb, (fan_out,), jnp.float32, -bound, bound)
    return w, b


def init_params(key, n_layer, n_embd):
    layers = []
    for _ in range(n_layer):
        key, ka, ko, kf, kp = jax.random.split(key, 5)
        w_attn, b_attn = _linear_init(ka, n_embd, 3 * n_embd)
        w_o, b_o = _linear_init(ko, n_embd, n_embd)
        w_fc, b_fc = _linear_init(kf, n_embd, 4 * n_embd)
        w_pr, b_pr = _linear_init(kp, 4 * n_embd, n_embd)
        layers.append(dict(
            ln_1_w=jnp.ones((n_embd,), jnp.float32),
            ln_1_b=jnp.zeros((n_embd,), jnp.float32),
            ln_2_w=jnp.ones((n_embd,), jnp.float32),
            ln_2_b=jnp.zeros((n_embd,), jnp.float32),
            w_attn=w_attn, b_attn=b_attn, w_o=w_o, b_o=b_o,
            w_fc=w_fc, b_fc=b_fc, w_proj2=w_pr, b_proj2=b_pr))
    return dict(layers=layers,
                ln_f_w=jnp.ones((n_embd,), jnp.float32),
                ln_f_b=jnp.zeros((n_embd,), jnp.float32))


if __name__ == "__main__":
    # Small config consistent with the module: n_layer=2, n_head=4, n_embd=32,
    # bias=True, dropout=0.0, stack_enc_dec=False, self-attention decoder.
    n_layer, n_head, n_embd = 2, 4, 32
    B, T = 2, 8

    key = jax.random.PRNGKey(0)
    key, kx = jax.random.split(key)
    params = init_params(key, n_layer, n_embd)
    x = jax.random.normal(kx, (B, T, n_embd), dtype=jnp.float32)

    causal_bool = jnp.tril(jnp.ones((T, T), dtype=bool))
    mask_bool = jnp.broadcast_to(causal_bool[None, None], (B, 1, T, T))

    # 1) causal mask generated in-kernel (no HBM mask), with / without sink.
    for attn_sink in (False, True):
        fwd = jax.jit(functools.partial(
            transformer_forward, n_head=n_head, causal=True,
            attn_sink=attn_sink, stack_enc_dec=False))
        y, mems = fwd(x, params)
        y = jax.block_until_ready(y)
        y_ref, mems_ref = _ref_transformer(x, params, mask_bool, n_head,
                                           attn_sink, False)
        assert y.shape == (B, T, n_embd)
        assert len(mems) == n_layer
        assert jnp.allclose(y, y_ref, atol=2e-3, rtol=2e-3), \
            f"transformer mismatch (causal, attn_sink={attn_sink})"
        for m_k, m_r in zip(mems, mems_ref):
            assert jnp.allclose(m_k, m_r, atol=2e-3, rtol=2e-3), \
                f"mems mismatch (causal, attn_sink={attn_sink})"

    # 2) explicit boolean-mask path (module semantics: mask passed by caller).
    fwd_mask = jax.jit(functools.partial(
        transformer_forward, n_head=n_head, causal=False,
        attn_sink=False, stack_enc_dec=False))
    y_m, _ = fwd_mask(x, params, mask_bool)
    y_m = jax.block_until_ready(y_m)
    y_ref, _ = _ref_transformer(x, params, mask_bool, n_head, False, False)
    assert jnp.allclose(y_m, y_ref, atol=2e-3, rtol=2e-3), \
        "transformer mismatch (explicit mask)"

    # 3) bf16 smoke test of the full stack (operands stay bf16, f32 MXU accum).
    params_bf = jax.tree_util.tree_map(lambda a: a.astype(jnp.bfloat16), params)
    fwd_bf = jax.jit(functools.partial(
        transformer_forward, n_head=n_head, causal=True, stack_enc_dec=False))
    y_bf, _ = fwd_bf(x.astype(jnp.bfloat16), params_bf)
    y_bf = jax.block_until_ready(y_bf)
    assert y_bf.shape == (B, T, n_embd)
    assert bool(jnp.all(jnp.isfinite(y_bf.astype(jnp.float32)))), "bf16 produced non-finite"

    print("KERNEL_OK")
</pallas_src>

<mosaic_0001>
module attributes {stable_mosaic.version = 11 : i64} {
  func.func @_ln_linear_kernel(%arg0: i32, %arg1: i32, %arg2: memref<16x32xf32, #tpu.memory_space<vmem>>, %arg3: memref<1x32xf32, #tpu.memory_space<vmem>>, %arg4: memref<1x32xf32, #tpu.memory_space<vmem>>, %arg5: memref<32x96xf32, #tpu.memory_space<vmem>>, %arg6: memref<1x96xf32, #tpu.memory_space<vmem>>, %arg7: memref<16x96xf32, #tpu.memory_space<vmem>>) attributes {dimension_semantics = [#tpu.dimension_semantics<parallel>, #tpu.dimension_semantics<parallel>], iteration_bounds = array<i64: 1, 1>, scalar_prefetch = 0 : i64, scratch_operands = 0 : i64, tpu.core_type = #tpu.core_type<tc>, window_params = [{transform_indices = @transform_0, window_bounds = array<i64: 16, 32>}, {pipeline_mode = #tpu.pipeline_mode<synchronous>, transform_indices = @transform_1, window_bounds = array<i64: 1, 32>}, {pipeline_mode = #tpu.pipeline_mode<synchronous>, transform_indices = @transform_2, window_bounds = array<i64: 1, 32>}, {transform_indices = @transform_3, window_bounds = array<i64: 32, 96>}, {transform_indices = @transform_4, window_bounds = array<i64: 1, 96>}, {transform_indices = @transform_5, window_bounds = array<i64: 16, 96>}]} {
    %c0 = arith.constant 0 : index
    %c0_0 = arith.constant 0 : index
    %0 = vector.load %arg2[%c0, %c0_0] : memref<16x32xf32, #tpu.memory_space<vmem>>, vector<16x32xf32>
    %cst = arith.constant dense<0.000000e+00> : vector<16xf32>
    %1 = vector.multi_reduction <add>, %0, %cst [1] : vector<16x32xf32> to vector<16xf32>
    %2 = vector.shape_cast %1 : vector<16xf32> to vector<16x1xf32>
    %cst_1 = arith.constant 3.200000e+01 : f32
    %3 = vector.broadcast %cst_1 : f32 to vector<16x1xf32>
    %4 = arith.divf %2, %3 : vector<16x1xf32>
    %5 = vector.broadcast %4 : vector<16x1xf32> to vector<16x32xf32>
    %6 = arith.subf %0, %5 : vector<16x32xf32>
    %7 = arith.mulf %6, %6 : vector<16x32xf32>
    %cst_2 = arith.constant dense<0.000000e+00> : vector<16xf32>
    %8 = vector.multi_reduction <add>, %7, %cst_2 [1] : vector<16x32xf32> to vector<16xf32>
    %9 = vector.shape_cast %8 : vector<16xf32> to vector<16x1xf32>
    %cst_3 = arith.constant 3.200000e+01 : f32
    %10 = vector.broadcast %cst_3 : f32 to vector<16x1xf32>
    %11 = arith.divf %9, %10 : vector<16x1xf32>
    %cst_4 = arith.constant 9.99999974E-6 : f32
    %12 = vector.broadcast %cst_4 : f32 to vector<16x1xf32>
    %13 = arith.addf %11, %12 : vector<16x1xf32>
    %14 = math.rsqrt %13 : vector<16x1xf32>
    %15 = vector.broadcast %14 : vector<16x1xf32> to vector<16x32xf32>
    %16 = arith.mulf %6, %15 : vector<16x32xf32>
    %c0_5 = arith.constant 0 : index
    %c0_6 = arith.constant 0 : index
    %17 = vector.load %arg3[%c0_5, %c0_6] : memref<1x32xf32, #tpu.memory_space<vmem>>, vector<1x32xf32>
    %18 = vector.broadcast %17 : vector<1x32xf32> to vector<16x32xf32>
    %19 = arith.mulf %16, %18 : vector<16x32xf32>
    %c0_7 = arith.constant 0 : index
    %c0_8 = arith.constant 0 : index
    %20 = vector.load %arg4[%c0_7, %c0_8] : memref<1x32xf32, #tpu.memory_space<vmem>>, vector<1x32xf32>
    %21 = vector.broadcast %20 : vector<1x32xf32> to vector<16x32xf32>
    %22 = arith.addf %19, %21 : vector<16x32xf32>
    %c0_9 = arith.constant 0 : index
    %c0_10 = arith.constant 0 : index
    %23 = vector.load %arg5[%c0_9, %c0_10] : memref<32x96xf32, #tpu.memory_space<vmem>>, vector<32x96xf32>
    %cst_11 = arith.constant dense<0.000000e+00> : vector<16x96xf32>
    %24 = tpu.matmul %22, %23, %cst_11 {dimension_numbers = #tpu.dot_dimension_numbers<[1], [0], [0], [1], [0, 0, 1, 1], [], []>} : vector<16x32xf32>, vector<32x96xf32>, vector<16x96xf32> -> vector<16x96xf32>
    %c0_12 = arith.constant 0 : index
    %c0_13 = arith.constant 0 : index
    %25 = vector.load %arg6[%c0_12, %c0_13] : memref<1x96xf32, #tpu.memory_space<vmem>>, vector<1x96xf32>
    %26 = vector.broadcast %25 : vector<1x96xf32> to vector<16x96xf32>
    %27 = arith.addf %24, %26 : vector<16x96xf32>
    %c0_14 = arith.constant 0 : index
    %c0_15 = arith.constant 0 : index
    %28 = vector.load %arg7[%c0_14, %c0_15] : memref<16x96xf32, #tpu.memory_space<vmem>>, vector<16x96xf32>
    tpu.vector_store %arg7[%c0_14, %c0_15], %27 {strides = array<i32>} : memref<16x96xf32, #tpu.memory_space<vmem>>, vector<16x96xf32>,
    return
  }
  func.func @transform_0(%arg0: i32, %arg1: i32) -> (i32, i32) {
    %c0_i32 = arith.constant 0 : i32
    %c0_i32_0 = arith.constant 0 : i32
    return %arg0, %c0_i32 : i32, i32
  }
  func.func @transform_1(%arg0: i32, %arg1: i32) -> (i32, i32) {
    %c0_i32 = arith.constant 0 : i32
    %c0_i32_0 = arith.constant 0 : i32
    %c0_i32_1 = arith.constant 0 : i32
    return %c0_i32, %c0_i32_0 : i32, i32
  }
  func.func @transform_2(%arg0: i32, %arg1: i32) -> (i32, i32) {
    %c0_i32 = arith.constant 0 : i32
    %c0_i32_0 = arith.constant 0 : i32
    %c0_i32_1 = arith.constant 0 : i32
    return %c0_i32, %c0_i32_0 : i32, i32
  }
  func.func @transform_3(%arg0: i32, %arg1: i32) -> (i32, i32) {
    %c0_i32 = arith.constant 0 : i32
    %c0_i32_0 = arith.constant 0 : i32
    return %c0_i32, %arg1 : i32, i32
  }
  func.func @transform_4(%arg0: i32, %arg1: i32) -> (i32, i32) {
    %c0_i32 = arith.constant 0 : i32
    %c0_i32_0 = arith.constant 0 : i32
    return %c0_i32, %arg1 : i32, i32
  }
  func.func @transform_5(%arg0: i32, %arg1: i32) -> (i32, i32) {
    %c0_i32 = arith.constant 0 : i32
    return %arg0, %arg1 : i32, i32
  }
}

module attributes {stable_mosaic.version = 11 : i64} {
  func.func @_flash_attn_kernel(%arg0: i32, %arg1: i32, %arg2: i32, %arg3: i32, %arg4: memref<1x1x1x8x8xf32, #tpu.memory_space<vmem>>, %arg5: memref<1x1x1x8x8xf32, #tpu.memory_space<vmem>>, %arg6: memref<1x1x1x8x8xf32, #tpu.memory_space<vmem>>, %arg7: memref<8x8xf32, #tpu.memory_space<vmem>>, %arg8: memref<8x8xf32, #tpu.memory_space<vmem>>, %arg9: memref<8x8xf32, #tpu.memory_space<vmem>>, %arg10: memref<8x8xf32, #tpu.memory_space<vmem>>, %arg11: memref<1x1x8x8xf32, #tpu.memory_space<vmem>>, %arg12: memref<8x1xf32, #tpu.memory_space<vmem>>, %arg13: memref<8x1xf32, #tpu.memory_space<vmem>>, %arg14: memref<8x8xf32, #tpu.memory_space<vmem>>) attributes {dimension_semantics = [#tpu.dimension_semantics<parallel>, #tpu.dimension_semantics<parallel>, #tpu.dimension_semantics<parallel>, #tpu.dimension_semantics<arbitrary>], iteration_bounds = array<i64: 2, 4, 1, 1>, scalar_prefetch = 0 : i64, scratch_operands = 3 : i64, tpu.core_type = #tpu.core_type<tc>, window_params = [{transform_indices = @transform_0, window_bounds = array<i64: 1, 1, 1, 8, 8>}, {transform_indices = @transform_1, window_bounds = array<i64: 1, 1, 1, 8, 8>}, {transform_indices = @transform_2, window_bounds = array<i64: 1, 1, 1, 8, 8>}, {transform_indices = @transform_3, window_bounds = array<i64: 8, 8>}, {transform_indices = @transform_4, window_bounds = array<i64: 8, 8>}, {transform_indices = @transform_5, window_bounds = array<i64: 8, 8>}, {transform_indices = @transform_6, window_bounds = array<i64: 8, 8>}, {transform_indices = @transform_7, window_bounds = array<i64: 1, 1, 8, 8>}]} {
    %c0_i32 = arith.constant 0 : i32
    %0 = arith.cmpi eq, %arg3, %c0_i32 : i32
    %1 = arith.extui %0 : i1 to i32
    %c0_i32_0 = arith.constant 0 : i32
    %2 = arith.cmpi ne, %1, %c0_i32_0 : i32
    scf.if %2 {
      %cst = arith.constant -1.000000e+30 : f32
      %12 = vector.broadcast %cst : f32 to vector<8x1xf32>
      %c0 = arith.constant 0 : index
      %c0_5 = arith.constant 0 : index
      %13 = vector.load %arg12[%c0, %c0_5] : memref<8x1xf32, #tpu.memory_space<vmem>>, vector<8x1xf32>
      tpu.vector_store %arg12[%c0, %c0_5], %12 {strides = array<i32>} : memref<8x1xf32, #tpu.memory_space<vmem>>, vector<8x1xf32>,
      %cst_6 = arith.constant 0.000000e+00 : f32
      %14 = vector.broadcast %cst_6 : f32 to vector<8x1xf32>
      %c0_7 = arith.constant 0 : index
      %c0_8 = arith.constant 0 : index
      %15 = vector.load %arg13[%c0_7, %c0_8] : memref<8x1xf32, #tpu.memory_space<vmem>>, vector<8x1xf32>
      tpu.vector_store %arg13[%c0_7, %c0_8], %14 {strides = array<i32>} : memref<8x1xf32, #tpu.memory_space<vmem>>, vector<8x1xf32>,
      %cst_9 = arith.constant 0.000000e+00 : f32
      %16 = vector.broadcast %cst_9 : f32 to vector<8x8xf32>
      %c0_10 = arith.constant 0 : index
      %c0_11 = arith.constant 0 : index
      %17 = vector.load %arg14[%c0_10, %c0_11] : memref<8x8xf32, #tpu.memory_space<vmem>>, vector<8x8xf32>
      tpu.vector_store %arg14[%c0_10, %c0_11], %16 {strides = array<i32>} : memref<8x8xf32, #tpu.memory_space<vmem>>, vector<8x8xf32>,
    } else {
    }
    %c8_i32 = arith.constant 8 : i32
    %3 = arith.muli %arg3, %c8_i32 : i32
    %c8_i32_1 = arith.constant 8 : i32
    %4 = arith.muli %arg2, %c8_i32_1 : i32
    %c7_i32 = arith.constant 7 : i32
    %5 = arith.addi %4, %c7_i32 : i32
    %6 = arith.cmpi sle, %3, %5 : i32
    %7 = arith.extui %6 : i1 to i32
    %c0_i32_2 = arith.constant 0 : i32
    %8 = arith.cmpi ne, %7, %c0_i32_2 : i32
    scf.if %8 {
      %c0 = arith.constant 0 : index
      %c0_5 = arith.constant 0 : index
      %c0_6 = arith.constant 0 : index
      %c0_7 = arith.constant 0 : index
      %c0_8 = arith.constant 0 : index
      %12 = vector.load %arg4[%c0, %c0_5, %c0_6, %c0_7, %c0_8] : memref<1x1x1x8x8xf32, #tpu.memory_space<vmem>>, vector<1x1x1x8x8xf32>
      %13 = vector.shape_cast %12 : vector<1x1x1x8x8xf32> to vector<8x8xf32>
      %c0_9 = arith.constant 0 : index
      %c0_10 = arith.constant 0 : index
      %c0_11 = arith.constant 0 : index
      %c0_12 = arith.constant 0 : index
      %c0_13 = arith.constant 0 : index
      %14 = vector.load %arg5[%c0_9, %c0_10, %c0_11, %c0_12, %c0_13] : memref<1x1x1x8x8xf32, #tpu.memory_space<vmem>>, vector<1x1x1x8x8xf32>
      %15 = vector.shape_cast %14 : vector<1x1x1x8x8xf32> to vector<8x8xf32>
      %c0_14 = arith.constant 0 : index
      %c0_15 = arith.constant 0 : index
      %16 = vector.load %arg7[%c0_14, %c0_15] : memref<8x8xf32, #tpu.memory_space<vmem>>, vector<8x8xf32>
      %17 = arith.mulf %13, %16 : vector<8x8xf32>
      %18 = vector.extract_strided_slice %13 {offsets = [0, 4], sizes = [8, 4], strides = [1, 1]} : vector<8x8xf32> to vector<8x4xf32>
      %cst = arith.constant 0.000000e+00 : f32
      %19 = vector.broadcast %cst : f32 to vector<8x4xf32>
      %20 = arith.subf %19, %18 : vector<8x4xf32>
      %21 = vector.extract_strided_slice %13 {offsets = [0, 0], sizes = [8, 4], strides = [1, 1]} : vector<8x8xf32> to vector<8x4xf32>
      %22 = tpu.concatenate %20, %21 in 1 : vector<8x4xf32>, vector<8x4xf32> -> vector<8x8xf32>
      %c0_16 = arith.constant 0 : index
      %c0_17 = arith.constant 0 : index
      %23 = vector.load %arg8[%c0_16, %c0_17] : memref<8x8xf32, #tpu.memory_space<vmem>>, vector<8x8xf32>
      %24 = arith.mulf %22, %23 : vector<8x8xf32>
      %25 = arith.addf %17, %24 : vector<8x8xf32>
      %c0_18 = arith.constant 0 : index
      %c0_19 = arith.constant 0 : index
      %26 = vector.load %arg9[%c0_18, %c0_19] : memref<8x8xf32, #tpu.memory_space<vmem>>, vector<8x8xf32>
      %27 = arith.mulf %15, %26 : vector<8x8xf32>
      %28 = vector.extract_strided_slice %15 {offsets = [0, 4], sizes = [8, 4], strides = [1, 1]} : vector<8x8xf32> to vector<8x4xf32>
      %cst_20 = arith.constant 0.000000e+00 : f32
      %29 = vector.broadcast %cst_20 : f32 to vector<8x4xf32>
      %30 = arith.subf %29, %28 : vector<8x4xf32>
      %31 = vector.extract_strided_slice %15 {offsets = [0, 0], sizes = [8, 4], strides = [1, 1]} : vector<8x8xf32> to vector<8x4xf32>
      %32 = tpu.concatenate %30, %31 in 1 : vector<8x4xf32>, vector<8x4xf32> -> vector<8x8xf32>
      %c0_21 = arith.constant 0 : index
      %c0_22 = arith.constant 0 : index
      %33 = vector.load %arg10[%c0_21, %c0_22] : memref<8x8xf32, #tpu.memory_space<vmem>>, vector<8x8xf32>
      %34 = arith.mulf %32, %33 : vector<8x8xf32>
      %35 = arith.addf %27, %34 : vector<8x8xf32>
      %cst_23 = arith.constant dense<0.000000e+00> : vector<8x8xf32>
      %36 = tpu.matmul %25, %35, %cst_23 {dimension_numbers = #tpu.dot_dimension_numbers<[1], [1], [0], [0], [0, 0, 1, 0], [], []>} : vector<8x8xf32>, vector<8x8xf32>, vector<8x8xf32> -> vector<8x8xf32>
      %cst_24 = arith.constant 0.353553385 : f32
      %37 = vector.broadcast %cst_24 : f32 to vector<8x8xf32>
      %38 = arith.mulf %36, %37 : vector<8x8xf32>
      %c8_i32_25 = arith.constant 8 : i32
      %39 = arith.muli %arg2, %c8_i32_25 : i32
      %40 = tpu.iota {dimensions = array<i32: 0>} : vector<8x8xi32>
      %41 = vector.broadcast %39 : i32 to vector<8x8xi32>
      %42 = arith.addi %41, %40 : vector<8x8xi32>
      %c8_i32_26 = arith.constant 8 : i32
      %43 = arith.muli %arg3, %c8_i32_26 : i32
      %44 = tpu.iota {dimensions = array<i32: 1>} : vector<8x8xi32>
      %45 = vector.broadcast %43 : i32 to vector<8x8xi32>
      %46 = arith.addi %45, %44 : vector<8x8xi32>
      %47 = arith.cmpi sge, %42, %46 : vector<8x8xi32>
      %cst_27 = arith.constant -1.000000e+30 : f32
      %48 = vector.broadcast %cst_27 : f32 to vector<8x8xf32>
      %49 = arith.select %47, %38, %48 : vector<8x8xi1>, vector<8x8xf32>
      %c0_28 = arith.constant 0 : index
      %c0_29 = arith.constant 0 : index
      %50 = vector.load %arg12[%c0_28, %c0_29] : memref<8x1xf32, #tpu.memory_space<vmem>>, vector<8x1xf32>
      %cst_30 = arith.constant dense<0xFF800000> : vector<8xf32>
      %51 = vector.multi_reduction <maximumf>, %49, %cst_30 [1] : vector<8x8xf32> to vector<8xf32>
      %52 = vector.shape_cast %51 : vector<8xf32> to vector<8x1xf32>
      %53 = arith.maximumf %50, %52 : vector<8x1xf32>
      %54 = arith.subf %50, %53 : vector<8x1xf32>
      %55 = math.exp %54 : vector<8x1xf32>
      %56 = vector.broadcast %53 : vector<8x1xf32> to vector<8x8xf32>
      %57 = arith.subf %49, %56 : vector<8x8xf32>
      %58 = math.exp %57 : vector<8x8xf32>
      %c0_31 = arith.constant 0 : index
      %c0_32 = arith.constant 0 : index
      %59 = vector.load %arg13[%c0_31, %c0_32] : memref<8x1xf32, #tpu.memory_space<vmem>>, vector<8x1xf32>
      %60 = arith.mulf %55, %59 : vector<8x1xf32>
      %cst_33 = arith.constant dense<0.000000e+00> : vector<8xf32>
      %61 = vector.multi_reduction <add>, %58, %cst_33 [1] : vector<8x8xf32> to vector<8xf32>
      %62 = vector.shape_cast %61 : vector<8xf32> to vector<8x1xf32>
      %63 = arith.addf %60, %62 : vector<8x1xf32>
      %c0_34 = arith.constant 0 : index
      %c0_35 = arith.constant 0 : index
      %64 = vector.load %arg13[%c0_34, %c0_35] : memref<8x1xf32, #tpu.memory_space<vmem>>, vector<8x1xf32>
      tpu.vector_store %arg13[%c0_34, %c0_35], %63 {strides = array<i32>} : memref<8x1xf32, #tpu.memory_space<vmem>>, vector<8x1xf32>,
      %c0_36 = arith.constant 0 : index
      %c0_37 = arith.constant 0 : index
      %65 = vector.load %arg14[%c0_36, %c0_37] : memref<8x8xf32, #tpu.memory_space<vmem>>, vector<8x8xf32>
      %66 = vector.broadcast %55 : vector<8x1xf32> to vector<8x8xf32>
      %67 = arith.mulf %66, %65 : vector<8x8xf32>
      %c0_38 = arith.constant 0 : index
      %c0_39 = arith.constant 0 : index
      %c0_40 = arith.constant 0 : index
      %c0_41 = arith.constant 0 : index
      %c0_42 = arith.constant 0 : index
      %68 = vector.load %arg6[%c0_38, %c0_39, %c0_40, %c0_41, %c0_42] : memref<1x1x1x8x8xf32, #tpu.memory_space<vmem>>, vector<1x1x1x8x8xf32>
      %69 = vector.shape_cast %68 : vector<1x1x1x8x8xf32> to vector<8x8xf32>
      %cst_43 = arith.constant dense<0.000000e+00> : vector<8x8xf32>
      %70 = tpu.matmul %58, %69, %cst_43 {dimension_numbers = #tpu.dot_dimension_numbers<[1], [0], [0], [1], [0, 0, 1, 1], [], []>} : vector<8x8xf32>, vector<8x8xf32>, vector<8x8xf32> -> vector<8x8xf32>
      %71 = arith.addf %67, %70 : vector<8x8xf32>
      %c0_44 = arith.constant 0 : index
      %c0_45 = arith.constant 0 : index
      %72 = vector.load %arg14[%c0_44, %c0_45] : memref<8x8xf32, #tpu.memory_space<vmem>>, vector<8x8xf32>
      tpu.vector_store %arg14[%c0_44, %c0_45], %71 {strides = array<i32>} : memref<8x8xf32, #tpu.memory_space<vmem>>, vector<8x8xf32>,
      %c0_46 = arith.constant 0 : index
      %c0_47 = arith.constant 0 : index
      %73 = vector.load %arg12[%c0_46, %c0_47] : memref<8x1xf32, #tpu.memory_space<vmem>>, vector<8x1xf32>
      tpu.vector_store %arg12[%c0_46, %c0_47], %53 {strides = array<i32>} : memref<8x1xf32, #tpu.memory_space<vmem>>, vector<8x1xf32>,
    } else {
    }
    %c0_i32_3 = arith.constant 0 : i32
    %9 = arith.cmpi eq, %arg3, %c0_i32_3 : i32
    %10 = arith.extui %9 : i1 to i32
    %c0_i32_4 = arith.constant 0 : i32
    %11 = arith.cmpi ne, %10, %c0_i32_4 : i32
    scf.if %11 {
      %c0 = arith.constant 0 : index
      %c0_5 = arith.constant 0 : index
      %12 = vector.load %arg13[%c0, %c0_5] : memref<8x1xf32, #tpu.memory_space<vmem>>, vector<8x1xf32>
      %c0_6 = arith.constant 0 : index
      %c0_7 = arith.constant 0 : index
      %13 = vector.load %arg14[%c0_6, %c0_7] : memref<8x8xf32, #tpu.memory_space<vmem>>, vector<8x8xf32>
      %14 = tpu.reciprocal %12 {approx = true} : vector<8x1xf32> -> vector<8x1xf32>
      %15 = vector.broadcast %14 : vector<8x1xf32> to vector<8x8xf32>
      %16 = arith.mulf %13, %15 : vector<8x8xf32>
      %c0_8 = arith.constant 0 : index
      %c0_9 = arith.constant 0 : index
      %c0_10 = arith.constant 0 : index
      %c0_11 = arith.constant 0 : index
      %17 = vector.load %arg11[%c0_8, %c0_9, %c0_10, %c0_11] : memref<1x1x8x8xf32, #tpu.memory_space<vmem>>, vector<1x1x8x8xf32>
      %18 = vector.shape_cast %17 : vector<1x1x8x8xf32> to vector<8x8xf32>
      %19 = vector.shape_cast %16 : vector<8x8xf32> to vector<1x1x8x8xf32>
      tpu.vector_store %arg11[%c0_8, %c0_9, %c0_10, %c0_11], %19 {strides = array<i32>} : memref<1x1x8x8xf32, #tpu.memory_space<vmem>>, vector<1x1x8x8xf32>,
    } else {
    }
    return
  }
  func.func @transform_0(%arg0: i32, %arg1: i32, %arg2: i32, %arg3: i32) -> (i32, i32, i32, i32, i32) {
    %c0_i32 = arith.constant 0 : i32
    %c0_i32_0 = arith.constant 0 : i32
    %c0_i32_1 = arith.constant 0 : i32
    return %c0_i32, %arg1, %arg0, %arg2, %c0_i32_0 : i32, i32, i32, i32, i32
  }
  func.func @transform_1(%arg0: i32, %arg1: i32, %arg2: i32, %arg3: i32) -> (i32, i32, i32, i32, i32) {
    %c1_i32 = arith.constant 1 : i32
    %c0_i32 = arith.constant 0 : i32
    %c0_i32_0 = arith.constant 0 : i32
    return %c1_i32, %arg1, %arg0, %arg3, %c0_i32 : i32, i32, i32, i32, i32
  }
  func.func @transform_2(%arg0: i32, %arg1: i32, %arg2: i32, %arg3: i32) -> (i32, i32, i32, i32, i32) {
    %c2_i32 = arith.constant 2 : i32
    %c0_i32 = arith.constant 0 : i32
    %c0_i32_0 = arith.constant 0 : i32
    return %c2_i32, %arg1, %arg0, %arg3, %c0_i32 : i32, i32, i32, i32, i32
  }
  func.func @transform_3(%arg0: i32, %arg1: i32, %arg2: i32, %arg3: i32) -> (i32, i32) {
    %c0_i32 = arith.constant 0 : i32
    %c0_i32_0 = arith.constant 0 : i32
    return %arg2, %c0_i32 : i32, i32
  }
  func.func @transform_4(%arg0: i32, %arg1: i32, %arg2: i32, %arg3: i32) -> (i32, i32) {
    %c0_i32 = arith.constant 0 : i32
    %c0_i32_0 = arith.constant 0 : i32
    return %arg2, %c0_i32 : i32, i32
  }
  func.func @transform_5(%arg0: i32, %arg1: i32, %arg2: i32, %arg3: i32) -> (i32, i32) {
    %c0_i32 = arith.constant 0 : i32
    %c0_i32_0 = arith.constant 0 : i32
    return %arg3, %c0_i32 : i32, i32
  }
  func.func @transform_6(%arg0: i32, %arg1: i32, %arg2: i32, %arg3: i32) -> (i32, i32) {
    %c0_i32 = arith.constant 0 : i32
    %c0_i32_0 = arith.constant 0 : i32
    return %arg3, %c0_i32 : i32, i32
  }
  func.func @transform_7(%arg0: i32, %arg1: i32, %arg2: i32, %arg3: i32) -> (i32, i32, i32, i32) {
    %c0_i32 = arith.constant 0 : i32
    %c0_i32_0 = arith.constant 0 : i32
    return %arg1, %arg0, %arg2, %c0_i32 : i32, i32, i32, i32
  }
}

module attributes {stable_mosaic.version = 11 : i64} {
  func.func @_attn_proj_kernel(%arg0: i32, %arg1: i32, %arg2: memref<1x16x8xf32, #tpu.memory_space<vmem>>, %arg3: memref<1x8x32xf32, #tpu.memory_space<vmem>>, %arg4: memref<1x32xf32, #tpu.memory_space<vmem>>, %arg5: memref<16x32xf32, #tpu.memory_space<vmem>>, %arg6: memref<16x32xf32, #tpu.memory_space<vmem>>, %arg7: memref<16x32xf32, #tpu.memory_space<vmem>>) attributes {dimension_semantics = [#tpu.dimension_semantics<parallel>, #tpu.dimension_semantics<arbitrary>], iteration_bounds = array<i64: 1, 4>, scalar_prefetch = 0 : i64, scratch_operands = 1 : i64, tpu.core_type = #tpu.core_type<tc>, window_params = [{transform_indices = @transform_0, window_bounds = array<i64: 1, 16, 8>}, {transform_indices = @transform_1, window_bounds = array<i64: 1, 8, 32>}, {pipeline_mode = #tpu.pipeline_mode<synchronous>, transform_indices = @transform_2, window_bounds = array<i64: 1, 32>}, {transform_indices = @transform_3, window_bounds = array<i64: 16, 32>}, {transform_indices = @transform_4, window_bounds = array<i64: 16, 32>}]} {
    %c0_i32 = arith.constant 0 : i32
    %0 = arith.cmpi eq, %arg1, %c0_i32 : i32
    %1 = arith.extui %0 : i1 to i32
    %c0_i32_0 = arith.constant 0 : i32
    %2 = arith.cmpi ne, %1, %c0_i32_0 : i32
    scf.if %2 {
      %cst_11 = arith.constant 0.000000e+00 : f32
      %14 = vector.broadcast %cst_11 : f32 to vector<16x32xf32>
      %c0_12 = arith.constant 0 : index
      %c0_13 = arith.constant 0 : index
      %15 = vector.load %arg7[%c0_12, %c0_13] : memref<16x32xf32, #tpu.memory_space<vmem>>, vector<16x32xf32>
      tpu.vector_store %arg7[%c0_12, %c0_13], %14 {strides = array<i32>} : memref<16x32xf32, #tpu.memory_space<vmem>>, vector<16x32xf32>,
    } else {
    }
    %c0 = arith.constant 0 : index
    %c0_1 = arith.constant 0 : index
    %3 = vector.load %arg7[%c0, %c0_1] : memref<16x32xf32, #tpu.memory_space<vmem>>, vector<16x32xf32>
    %c0_2 = arith.constant 0 : index
    %c0_3 = arith.constant 0 : index
    %c0_4 = arith.constant 0 : index
    %4 = vector.load %arg2[%c0_2, %c0_3, %c0_4] : memref<1x16x8xf32, #tpu.memory_space<vmem>>, vector<1x16x8xf32>
    %5 = vector.shape_cast %4 : vector<1x16x8xf32> to vector<16x8xf32>
    %c0_5 = arith.constant 0 : index
    %c0_6 = arith.constant 0 : index
    %c0_7 = arith.constant 0 : index
    %6 = vector.load %arg3[%c0_5, %c0_6, %c0_7] : memref<1x8x32xf32, #tpu.memory_space<vmem>>, vector<1x8x32xf32>
    %7 = vector.shape_cast %6 : vector<1x8x32xf32> to vector<8x32xf32>
    %cst = arith.constant dense<0.000000e+00> : vector<16x32xf32>
    %8 = tpu.matmul %5, %7, %cst {dimension_numbers = #tpu.dot_dimension_numbers<[1], [0], [0], [1], [0, 0, 1, 1], [], []>} : vector<16x8xf32>, vector<8x32xf32>, vector<16x32xf32> -> vector<16x32xf32>
    %9 = arith.addf %3, %8 : vector<16x32xf32>
    %c0_8 = arith.constant 0 : index
    %c0_9 = arith.constant 0 : index
    %10 = vector.load %arg7[%c0_8, %c0_9] : memref<16x32xf32, #tpu.memory_space<vmem>>, vector<16x32xf32>
    tpu.vector_store %arg7[%c0_8, %c0_9], %9 {strides = array<i32>} : memref<16x32xf32, #tpu.memory_space<vmem>>, vector<16x32xf32>,
    %c3_i32 = arith.constant 3 : i32
    %11 = arith.cmpi eq, %arg1, %c3_i32 : i32
    %12 = arith.extui %11 : i1 to i32
    %c0_i32_10 = arith.constant 0 : i32
    %13 = arith.cmpi ne, %12, %c0_i32_10 : i32
    scf.if %13 {
      %c0_11 = arith.constant 0 : index
      %c0_12 = arith.constant 0 : index
      %14 = vector.load %arg7[%c0_11, %c0_12] : memref<16x32xf32, #tpu.memory_space<vmem>>, vector<16x32xf32>
      %c0_13 = arith.constant 0 : index
      %c0_14 = arith.constant 0 : index
      %15 = vector.load %arg4[%c0_13, %c0_14] : memref<1x32xf32, #tpu.memory_space<vmem>>, vector<1x32xf32>
      %16 = vector.broadcast %15 : vector<1x32xf32> to vector<16x32xf32>
      %17 = arith.addf %14, %16 : vector<16x32xf32>
      %c0_15 = arith.constant 0 : index
      %c0_16 = arith.constant 0 : index
      %18 = vector.load %arg5[%c0_15, %c0_16] : memref<16x32xf32, #tpu.memory_space<vmem>>, vector<16x32xf32>
      %19 = arith.addf %17, %18 : vector<16x32xf32>
      %c0_17 = arith.constant 0 : index
      %c0_18 = arith.constant 0 : index
      %20 = vector.load %arg6[%c0_17, %c0_18] : memref<16x32xf32, #tpu.memory_space<vmem>>, vector<16x32xf32>
      tpu.vector_store %arg6[%c0_17, %c0_18], %19 {strides = array<i32>} : memref<16x32xf32, #tpu.memory_space<vmem>>, vector<16x32xf32>,
    } else {
    }
    return
  }
  func.func @transform_0(%arg0: i32, %arg1: i32) -> (i32, i32, i32) {
    %c0_i32 = arith.constant 0 : i32
    %c0_i32_0 = arith.constant 0 : i32
    return %arg1, %arg0, %c0_i32 : i32, i32, i32
  }
  func.func @transform_1(%arg0: i32, %arg1: i32) -> (i32, i32, i32) {
    %c0_i32 = arith.constant 0 : i32
    %c0_i32_0 = arith.constant 0 : i32
    %c0_i32_1 = arith.constant 0 : i32
    return %arg1, %c0_i32, %c0_i32_0 : i32, i32, i32
  }
  func.func @transform_2(%arg0: i32, %arg1: i32) -> (i32, i32) {
    %c0_i32 = arith.constant 0 : i32
    %c0_i32_0 = arith.constant 0 : i32
    %c0_i32_1 = arith.constant 0 : i32
    return %c0_i32, %c0_i32_0 : i32, i32
  }
  func.func @transform_3(%arg0: i32, %arg1: i32) -> (i32, i32) {
    %c0_i32 = arith.constant 0 : i32
    %c0_i32_0 = arith.constant 0 : i32
    return %arg0, %c0_i32 : i32, i32
  }
  func.func @transform_4(%arg0: i32, %arg1: i32) -> (i32, i32) {
    %c0_i32 = arith.constant 0 : i32
    %c0_i32_0 = arith.constant 0 : i32
    return %arg0, %c0_i32 : i32, i32
  }
}

module attributes {stable_mosaic.version = 11 : i64} {
  func.func @_mlp_kernel(%arg0: i32, %arg1: i32, %arg2: memref<16x32xf32, #tpu.memory_space<vmem>>, %arg3: memref<1x32xf32, #tpu.memory_space<vmem>>, %arg4: memref<1x32xf32, #tpu.memory_space<vmem>>, %arg5: memref<32x128xf32, #tpu.memory_space<vmem>>, %arg6: memref<1x128xf32, #tpu.memory_space<vmem>>, %arg7: memref<128x32xf32, #tpu.memory_space<vmem>>, %arg8: memref<1x32xf32, #tpu.memory_space<vmem>>, %arg9: memref<16x32xf32, #tpu.memory_space<vmem>>, %arg10: memref<16x32xf32, #tpu.memory_space<vmem>>) attributes {dimension_semantics = [#tpu.dimension_semantics<parallel>, #tpu.dimension_semantics<arbitrary>], iteration_bounds = array<i64: 1, 1>, scalar_prefetch = 0 : i64, scratch_operands = 1 : i64, tpu.core_type = #tpu.core_type<tc>, window_params = [{transform_indices = @transform_0, window_bounds = array<i64: 16, 32>}, {pipeline_mode = #tpu.pipeline_mode<synchronous>, transform_indices = @transform_1, window_bounds = array<i64: 1, 32>}, {pipeline_mode = #tpu.pipeline_mode<synchronous>, transform_indices = @transform_2, window_bounds = array<i64: 1, 32>}, {transform_indices = @transform_3, window_bounds = array<i64: 32, 128>}, {transform_indices = @transform_4, window_bounds = array<i64: 1, 128>}, {transform_indices = @transform_5, window_bounds = array<i64: 128, 32>}, {pipeline_mode = #tpu.pipeline_mode<synchronous>, transform_indices = @transform_6, window_bounds = array<i64: 1, 32>}, {transform_indices = @transform_7, window_bounds = array<i64: 16, 32>}]} {
    %c0_i32 = arith.constant 0 : i32
    %0 = arith.cmpi eq, %arg1, %c0_i32 : i32
    %1 = arith.extui %0 : i1 to i32
    %c0_i32_0 = arith.constant 0 : i32
    %2 = arith.cmpi ne, %1, %c0_i32_0 : i32
    scf.if %2 {
      %cst_27 = arith.constant 0.000000e+00 : f32
      %47 = vector.broadcast %cst_27 : f32 to vector<16x32xf32>
      %c0_28 = arith.constant 0 : index
      %c0_29 = arith.constant 0 : index
      %48 = vector.load %arg10[%c0_28, %c0_29] : memref<16x32xf32, #tpu.memory_space<vmem>>, vector<16x32xf32>
      tpu.vector_store %arg10[%c0_28, %c0_29], %47 {strides = array<i32>} : memref<16x32xf32, #tpu.memory_space<vmem>>, vector<16x32xf32>,
    } else {
    }
    %c0 = arith.constant 0 : index
    %c0_1 = arith.constant 0 : index
    %3 = vector.load %arg2[%c0, %c0_1] : memref<16x32xf32, #tpu.memory_space<vmem>>, vector<16x32xf32>
    %cst = arith.constant dense<0.000000e+00> : vector<16xf32>
    %4 = vector.multi_reduction <add>, %3, %cst [1] : vector<16x32xf32> to vector<16xf32>
    %5 = vector.shape_cast %4 : vector<16xf32> to vector<16x1xf32>
    %cst_2 = arith.constant 3.200000e+01 : f32
    %6 = vector.broadcast %cst_2 : f32 to vector<16x1xf32>
    %7 = arith.divf %5, %6 : vector<16x1xf32>
    %8 = vector.broadcast %7 : vector<16x1xf32> to vector<16x32xf32>
    %9 = arith.subf %3, %8 : vector<16x32xf32>
    %10 = arith.mulf %9, %9 : vector<16x32xf32>
    %cst_3 = arith.constant dense<0.000000e+00> : vector<16xf32>
    %11 = vector.multi_reduction <add>, %10, %cst_3 [1] : vector<16x32xf32> to vector<16xf32>
    %12 = vector.shape_cast %11 : vector<16xf32> to vector<16x1xf32>
    %cst_4 = arith.constant 3.200000e+01 : f32
    %13 = vector.broadcast %cst_4 : f32 to vector<16x1xf32>
    %14 = arith.divf %12, %13 : vector<16x1xf32>
    %cst_5 = arith.constant 9.99999974E-6 : f32
    %15 = vector.broadcast %cst_5 : f32 to vector<16x1xf32>
    %16 = arith.addf %14, %15 : vector<16x1xf32>
    %17 = math.rsqrt %16 : vector<16x1xf32>
    %18 = vector.broadcast %17 : vector<16x1xf32> to vector<16x32xf32>
    %19 = arith.mulf %9, %18 : vector<16x32xf32>
    %c0_6 = arith.constant 0 : index
    %c0_7 = arith.constant 0 : index
    %20 = vector.load %arg3[%c0_6, %c0_7] : memref<1x32xf32, #tpu.memory_space<vmem>>, vector<1x32xf32>
    %21 = vector.broadcast %20 : vector<1x32xf32> to vector<16x32xf32>
    %22 = arith.mulf %19, %21 : vector<16x32xf32>
    %c0_8 = arith.constant 0 : index
    %c0_9 = arith.constant 0 : index
    %23 = vector.load %arg4[%c0_8, %c0_9] : memref<1x32xf32, #tpu.memory_space<vmem>>, vector<1x32xf32>
    %24 = vector.broadcast %23 : vector<1x32xf32> to vector<16x32xf32>
    %25 = arith.addf %22, %24 : vector<16x32xf32>
    %c0_10 = arith.constant 0 : index
    %c0_11 = arith.constant 0 : index
    %26 = vector.load %arg5[%c0_10, %c0_11] : memref<32x128xf32, #tpu.memory_space<vmem>>, vector<32x128xf32>
    %cst_12 = arith.constant dense<0.000000e+00> : vector<16x128xf32>
    %27 = tpu.matmul %25, %26, %cst_12 {dimension_numbers = #tpu.dot_dimension_numbers<[1], [0], [0], [1], [0, 0, 1, 1], [], []>} : vector<16x32xf32>, vector<32x128xf32>, vector<16x128xf32> -> vector<16x128xf32>
    %c0_13 = arith.constant 0 : index
    %c0_14 = arith.constant 0 : index
    %28 = vector.load %arg6[%c0_13, %c0_14] : memref<1x128xf32, #tpu.memory_space<vmem>>, vector<1x128xf32>
    %29 = vector.broadcast %28 : vector<1x128xf32> to vector<16x128xf32>
    %30 = arith.addf %27, %29 : vector<16x128xf32>
    %cst_15 = arith.constant 5.000000e-01 : f32
    %31 = vector.broadcast %cst_15 : f32 to vector<16x128xf32>
    %32 = arith.mulf %31, %30 : vector<16x128xf32>
    %cst_16 = arith.constant 0.707106769 : f32
    %33 = vector.broadcast %cst_16 : f32 to vector<16x128xf32>
    %34 = arith.mulf %30, %33 : vector<16x128xf32>
    %35 = math.erf %34 : vector<16x128xf32>
    %cst_17 = arith.constant 1.000000e+00 : f32
    %36 = vector.broadcast %cst_17 : f32 to vector<16x128xf32>
    %37 = arith.addf %36, %35 : vector<16x128xf32>
    %38 = arith.mulf %32, %37 : vector<16x128xf32>
    %c0_18 = arith.constant 0 : index
    %c0_19 = arith.constant 0 : index
    %39 = vector.load %arg10[%c0_18, %c0_19] : memref<16x32xf32, #tpu.memory_space<vmem>>, vector<16x32xf32>
    %c0_20 = arith.constant 0 : index
    %c0_21 = arith.constant 0 : index
    %40 = vector.load %arg7[%c0_20, %c0_21] : memref<128x32xf32, #tpu.memory_space<vmem>>, vector<128x32xf32>
    %cst_22 = arith.constant dense<0.000000e+00> : vector<16x32xf32>
    %41 = tpu.matmul %38, %40, %cst_22 {dimension_numbers = #tpu.dot_dimension_numbers<[1], [0], [0], [1], [0, 0, 1, 1], [], []>} : vector<16x128xf32>, vector<128x32xf32>, vector<16x32xf32> -> vector<16x32xf32>
    %42 = arith.addf %39, %41 : vector<16x32xf32>
    %c0_23 = arith.constant 0 : index
    %c0_24 = arith.constant 0 : index
    %43 = vector.load %arg10[%c0_23, %c0_24] : memref<16x32xf32, #tpu.memory_space<vmem>>, vector<16x32xf32>
    tpu.vector_store %arg10[%c0_23, %c0_24], %42 {strides = array<i32>} : memref<16x32xf32, #tpu.memory_space<vmem>>, vector<16x32xf32>,
    %c0_i32_25 = arith.constant 0 : i32
    %44 = arith.cmpi eq, %arg1, %c0_i32_25 : i32
    %45 = arith.extui %44 : i1 to i32
    %c0_i32_26 = arith.constant 0 : i32
    %46 = arith.cmpi ne, %45, %c0_i32_26 : i32
    scf.if %46 {
      %c0_27 = arith.constant 0 : index
      %c0_28 = arith.constant 0 : index
      %47 = vector.load %arg10[%c0_27, %c0_28] : memref<16x32xf32, #tpu.memory_space<vmem>>, vector<16x32xf32>
      %c0_29 = arith.constant 0 : index
      %c0_30 = arith.constant 0 : index
      %48 = vector.load %arg8[%c0_29, %c0_30] : memref<1x32xf32, #tpu.memory_space<vmem>>, vector<1x32xf32>
      %49 = vector.broadcast %48 : vector<1x32xf32> to vector<16x32xf32>
      %50 = arith.addf %47, %49 : vector<16x32xf32>
      %c0_31 = arith.constant 0 : index
      %c0_32 = arith.constant 0 : index
      %51 = vector.load %arg2[%c0_31, %c0_32] : memref<16x32xf32, #tpu.memory_space<vmem>>, vector<16x32xf32>
      %52 = arith.addf %50, %51 : vector<16x32xf32>
      %c0_33 = arith.constant 0 : index
      %c0_34 = arith.constant 0 : index
      %53 = vector.load %arg9[%c0_33, %c0_34] : memref<16x32xf32, #tpu.memory_space<vmem>>, vector<16x32xf32>
      tpu.vector_store %arg9[%c0_33, %c0_34], %52 {strides = array<i32>} : memref<16x32xf32, #tpu.memory_space<vmem>>, vector<16x32xf32>,
    } else {
    }
    return
  }
  func.func @transform_0(%arg0: i32, %arg1: i32) -> (i32, i32) {
    %c0_i32 = arith.constant 0 : i32
    %c0_i32_0 = arith.constant 0 : i32
    return %arg0, %c0_i32 : i32, i32
  }
  func.func @transform_1(%arg0: i32, %arg1: i32) -> (i32, i32) {
    %c0_i32 = arith.constant 0 : i32
    %c0_i32_0 = arith.constant 0 : i32
    %c0_i32_1 = arith.constant 0 : i32
    return %c0_i32, %c0_i32_0 : i32, i32
  }
  func.func @transform_2(%arg0: i32, %arg1: i32) -> (i32, i32) {
    %c0_i32 = arith.constant 0 : i32
    %c0_i32_0 = arith.constant 0 : i32
    %c0_i32_1 = arith.constant 0 : i32
    return %c0_i32, %c0_i32_0 : i32, i32
  }
  func.func @transform_3(%arg0: i32, %arg1: i32) -> (i32, i32) {
    %c0_i32 = arith.constant 0 : i32
    %c0_i32_0 = arith.constant 0 : i32
    return %c0_i32, %arg1 : i32, i32
  }
  func.func @transform_4(%arg0: i32, %arg1: i32) -> (i32, i32) {
    %c0_i32 = arith.constant 0 : i32
    %c0_i32_0 = arith.constant 0 : i32
    return %c0_i32, %arg1 : i32, i32
  }
  func.func @transform_5(%arg0: i32, %arg1: i32) -> (i32, i32) {
    %c0_i32 = arith.constant 0 : i32
    %c0_i32_0 = arith.constant 0 : i32
    return %arg1, %c0_i32 : i32, i32
  }
  func.func @transform_6(%arg0: i32, %arg1: i32) -> (i32, i32) {
    %c0_i32 = arith.constant 0 : i32
    %c0_i32_0 = arith.constant 0 : i32
    %c0_i32_1 = arith.constant 0 : i32
    return %c0_i32, %c0_i32_0 : i32, i32
  }
  func.func @transform_7(%arg0: i32, %arg1: i32) -> (i32, i32) {
    %c0_i32 = arith.constant 0 : i32
    %c0_i32_0 = arith.constant 0 : i32
    return %arg0, %c0_i32 : i32, i32
  }
}

module attributes {stable_mosaic.version = 11 : i64} {
  func.func @_ln_kernel(%arg0: i32, %arg1: memref<16x32xf32, #tpu.memory_space<vmem>>, %arg2: memref<1x32xf32, #tpu.memory_space<vmem>>, %arg3: memref<1x32xf32, #tpu.memory_space<vmem>>, %arg4: memref<16x32xf32, #tpu.memory_space<vmem>>) attributes {dimension_semantics = [#tpu.dimension_semantics<parallel>], iteration_bounds = array<i64: 1>, scalar_prefetch = 0 : i64, scratch_operands = 0 : i64, tpu.core_type = #tpu.core_type<tc>, window_params = [{transform_indices = @transform_0, window_bounds = array<i64: 16, 32>}, {pipeline_mode = #tpu.pipeline_mode<synchronous>, transform_indices = @transform_1, window_bounds = array<i64: 1, 32>}, {pipeline_mode = #tpu.pipeline_mode<synchronous>, transform_indices = @transform_2, window_bounds = array<i64: 1, 32>}, {transform_indices = @transform_3, window_bounds = array<i64: 16, 32>}]} {
    %c0 = arith.constant 0 : index
    %c0_0 = arith.constant 0 : index
    %0 = vector.load %arg1[%c0, %c0_0] : memref<16x32xf32, #tpu.memory_space<vmem>>, vector<16x32xf32>
    %cst = arith.constant dense<0.000000e+00> : vector<16xf32>
    %1 = vector.multi_reduction <add>, %0, %cst [1] : vector<16x32xf32> to vector<16xf32>
    %2 = vector.shape_cast %1 : vector<16xf32> to vector<16x1xf32>
    %cst_1 = arith.constant 3.200000e+01 : f32
    %3 = vector.broadcast %cst_1 : f32 to vector<16x1xf32>
    %4 = arith.divf %2, %3 : vector<16x1xf32>
    %5 = vector.broadcast %4 : vector<16x1xf32> to vector<16x32xf32>
    %6 = arith.subf %0, %5 : vector<16x32xf32>
    %7 = arith.mulf %6, %6 : vector<16x32xf32>
    %cst_2 = arith.constant dense<0.000000e+00> : vector<16xf32>
    %8 = vector.multi_reduction <add>, %7, %cst_2 [1] : vector<16x32xf32> to vector<16xf32>
    %9 = vector.shape_cast %8 : vector<16xf32> to vector<16x1xf32>
    %cst_3 = arith.constant 3.200000e+01 : f32
    %10 = vector.broadcast %cst_3 : f32 to vector<16x1xf32>
    %11 = arith.divf %9, %10 : vector<16x1xf32>
    %cst_4 = arith.constant 9.99999974E-6 : f32
    %12 = vector.broadcast %cst_4 : f32 to vector<16x1xf32>
    %13 = arith.addf %11, %12 : vector<16x1xf32>
    %14 = math.rsqrt %13 : vector<16x1xf32>
    %15 = vector.broadcast %14 : vector<16x1xf32> to vector<16x32xf32>
    %16 = arith.mulf %6, %15 : vector<16x32xf32>
    %c0_5 = arith.constant 0 : index
    %c0_6 = arith.constant 0 : index
    %17 = vector.load %arg2[%c0_5, %c0_6] : memref<1x32xf32, #tpu.memory_space<vmem>>, vector<1x32xf32>
    %18 = vector.broadcast %17 : vector<1x32xf32> to vector<16x32xf32>
    %19 = arith.mulf %16, %18 : vector<16x32xf32>
    %c0_7 = arith.constant 0 : index
    %c0_8 = arith.constant 0 : index
    %20 = vector.load %arg3[%c0_7, %c0_8] : memref<1x32xf32, #tpu.memory_space<vmem>>, vector<1x32xf32>
    %21 = vector.broadcast %20 : vector<1x32xf32> to vector<16x32xf32>
    %22 = arith.addf %19, %21 : vector<16x32xf32>
    %c0_9 = arith.constant 0 : index
    %c0_10 = arith.constant 0 : index
    %23 = vector.load %arg4[%c0_9, %c0_10] : memref<16x32xf32, #tpu.memory_space<vmem>>, vector<16x32xf32>
    tpu.vector_store %arg4[%c0_9, %c0_10], %22 {strides = array<i32>} : memref<16x32xf32, #tpu.memory_space<vmem>>, vector<16x32xf32>,
    return
  }
  func.func @transform_0(%arg0: i32) -> (i32, i32) {
    %c0_i32 = arith.constant 0 : i32
    %c0_i32_0 = arith.constant 0 : i32
    return %arg0, %c0_i32 : i32, i32
  }
  func.func @transform_1(%arg0: i32) -> (i32, i32) {
    %c0_i32 = arith.constant 0 : i32
    %c0_i32_0 = arith.constant 0 : i32
    %c0_i32_1 = arith.constant 0 : i32
    return %c0_i32, %c0_i32_0 : i32, i32
  }
  func.func @transform_2(%arg0: i32) -> (i32, i32) {
    %c0_i32 = arith.constant 0 : i32
    %c0_i32_0 = arith.constant 0 : i32
    %c0_i32_1 = arith.constant 0 : i32
    return %c0_i32, %c0_i32_0 : i32, i32
  }
  func.func @transform_3(%arg0: i32) -> (i32, i32) {
    %c0_i32 = arith.constant 0 : i32
    %c0_i32_0 = arith.constant 0 : i32
    return %arg0, %c0_i32 : i32, i32
  }
}

</mosaic_0001>

<bundles_post_ra>
// kernel: transformer_forward.11
= control target key start
LH: loop header
LB: loop body
LE: loop exit
PB: predicated region body
PF: predicated region fallthrough
CT: control target
= control target key end

     0   :  { %s520_s15 = smov 0   ;;  %s522_s16 = smov 0   ;;  %s578_s0 = inlined_call_operand.vmem [shape: f32[4,16,8], index: 0, kind: input, shape index: {}]   ;;  %s579_s1 = inlined_call_operand.vmem [shape: f32[4,8,32], index: 1, kind: input, shape index: {}]   ;;  %s580_s2 = inlined_call_operand.vmem [shape: f32[1,32], index: 2, kind: input, shape index: {}]   ;;  %s581_s3 = inlined_call_operand.vmem [shape: f32[16,32], index: 3, kind: input, shape index: {}]   ;;  %s582_s4 = inlined_call_operand.vmem [shape: f32[16,32], index: 4, kind: output, shape index: {}]  }
   0x1   :  { %s524_s17 = smov 0  }
   0x2 LB: > { %s23_s18 = sadd.s32 1, %s488_s16  ;;  %p430_p0 = scmp.ge.s32.totalorder %s492_s17, 1  ;;  %s492_s17 = sphi %s524_s17, %s14_s17   ;;  %s488_s16 = sphi %s522_s16, %s584_s16   ;;  %s484_s15 = sphi %s520_s15, %s583_s15  }
   0x3   : > { %p24_p1 = scmp.ge.s32.totalorder %s23_s18, 4  ;;  %p201_p2 = scmp.lt.s32.totalorder %s492_s17, 5 }
   0x5   : > { %s586_s18 = smov (%p24_p1, %s23_s18), 0  ;;  %p202_p3 = pnand %p430_p0, %p201_p2 }
   0x6   : > { %p241_p4 = scmp.lt.s32.totalorder (!%p202_p3), %s484_s15, 3  ;;  %p434_p5 = scmp.ne.s32.totalorder (!%p202_p3), %s484_s15, 0 }
   0x7   : > { %205 = sbr.rel (%p202_p3) target bundleno = 165 (0xa5), region = 36 }
   0xc   : > { %s242_s19 = scalar_select %p241_p4, %s484_s15, 3 }
   0xd   : > { %269 = sbr.rel (%p434_p5) target bundleno = 21 (0x15), region = 40 }
   0xe   : > { %s442_s20 = sshll.u32 %s242_s19, 4  ;;  %s433_s21 = sshll.u32 %s242_s19, 3 }
   0xf   : > { %s248_s24 = scalar_lea.vmem %s578_s0, %s442_s20  ;;  %s253_s27 = scalar_lea.vmem %s579_s1, %s433_s21 }
  0x12   : > { %vm270_vm0 = vcmask 261120   ;;  %v494_v0 = vmov 0.0  }
  0x13   : > { %271 = vst.msk [vmem:[#allocation2] sm:$0xff] %vm270_vm0, %v494_v0 }
  0x14   : > { %272 = vst.msk [vmem:[#allocation2 + $0x8] sm:$0xff] %vm270_vm0, %v494_v0 }
  0x15 PF: > { %v277_v1 = vld [vmem:[%s253_s27] sm:$0xff]  ;;  %vm278_vm1 = vcmask 64512   ;;  %v276_v3 = vld [vmem:[%s248_s24 + $0x8] sm:$0xff]  ;;  %vm310_vm2 = vcmask 261120   ;;  %p437_p6 = scmp.ne.s32.totalorder %s484_s15, 3 }
  0x16   : > { %v275_v2 = vld [vmem:[%s248_s24] sm:$0xff]  ;;  %300 = vmatpush.msra.mxu0 %v277_v1  ;;  %443 = vmatpush.msra.mxu1 %v277_v1 }
  0x17   : > { %435 = vmatmul.msk.f32.vlgmr.msra.gmra.mxu0 %vm278_vm1, %v275_v2  ;;  %436 = vmatmul.msk.f32.vlgmr.msra.gmra.mxu1 %vm278_vm1, %v276_v3 }
  0x1a   : > { %v273_v4 = vld [vmem:[#allocation2] sm:$0xff] }
  0x1b   : > { %v274_v5 = vld [vmem:[#allocation2 + $0x8] sm:$0xff] }
  0x94   : > { %v302_v6 = vpop.f32.mrf.mxu0  ;;  %v305_v7 = vpop.f32.mrf.mxu1  ;;  %316 = sbr.rel (%p437_p6) target bundleno = 165 (0xa5), region = 44 }
  0x95   : > { %v308_v8 = vadd.f32 %v302_v6, %v273_v4  ;;  %v309_v9 = vadd.f32 %v305_v7, %v274_v5 }
  0x97   : > { %311 = vst.msk [vmem:[#allocation2] sm:$0xff] %vm310_vm2, %v308_v8 }
  0x98   : > { %312 = vst.msk [vmem:[#allocation2 + $0x8] sm:$0xff] %vm310_vm2, %v309_v9 }
  0x99   : > { %v469_v11 = vld [vmem:[%s580_s2] ss:$0 sm:$0xff]  ;;  %v326_v14 = vld [vmem:[%s581_s3 + $0x8] sm:$0xff] }
  0x9a   : > { %v325_v12 = vld [vmem:[%s581_s3] sm:$0xff] }
  0x9e   : > { %v317_v10 = vld [vmem:[#allocation2] sm:$0xff] }
  0x9f   : > { %v318_v13 = vld [vmem:[#allocation2 + $0x8] sm:$0xff]  ;;  %v323_v15 = vadd.f32 %v469_v11, %v317_v10 }
  0xa0   : > { %v324_v16 = vadd.f32 %v469_v11, %v318_v13 }
  0xa1   : > { %v327_v17 = vadd.f32 %v325_v12, %v323_v15 }
  0xa2   : > { %v328_v18 = vadd.f32 %v326_v14, %v324_v16 }
  0xa3   : > { %329 = vst.msk [vmem:[%s582_s4] sm:$0xff] %vm310_vm2, %v327_v17 }
  0xa4   : > { %330 = vst.msk [vmem:[%s582_s4 + $0x8] sm:$0xff] %vm310_vm2, %v328_v18 }
  0xa5 PF: > { %s14_s17 = sadd.s32 1, %s492_s17   ;;  %s583_s15 = smov %s488_s16 }
  0xa6   : > { %p11_p7 = scmp.ge.s32.totalorder %s14_s17, 6   ;;  %s584_s16 = smov %s586_s18 }
  0xa8   :  { %13 = sbr.rel (!%p11_p7) target bundleno = 2 (0x2), region = 80 }

// kernel: transformer_forward.9
= control target key start
LH: loop header
LB: loop body
LE: loop exit
PB: predicated region body
PF: predicated region fallthrough
CT: control target
= control target key end

     0   :  { %vm22_vm0 = vcmask 261120   ;;  %v146_v4 = vmov 32.0   ;;  %vm123_vm8 = vcmask 785408   ;;  %s216_s0 = inlined_call_operand.vmem [shape: f32[16,32], index: 0, kind: input, shape index: {}]   ;;  %s217_s1 = inlined_call_operand.vmem [shape: f32[1,32], index: 1, kind: input, shape index: {}]   ;;  %s218_s2 = inlined_call_operand.vmem [shape: f32[1,32], index: 2, kind: input, shape index: {}]   ;;  %s219_s4 = inlined_call_operand.vmem [shape: f32[1,96], index: 4, kind: input, shape index: {}]   ;;  %s220_s3 = inlined_call_operand.vmem [shape: f32[32,96], index: 3, kind: input, shape index: {}]   ;;  %s221_s5 = inlined_call_operand.vmem [shape: f32[16,96], index: 5, kind: output, shape index: {}]  }
   0x1   :  { %v20_v0 = vld [vmem:[%s216_s0] sm:$0xff]  ;;  %v21_v2 = vld [vmem:[%s216_s0 + $0x8] sm:$0xff]  ;;  %140 = vrcp.f32 %v146_v4  ;;  %v89_v21 = vld [vmem:[%s220_s3 + $0x18] sm:$0xff] }
   0x2   :  { %v23_v1 = vsel %vm22_vm0, %v20_v0, 0.0  ;;  %v26_v3 = vsel %vm22_vm0, %v21_v2, 0.0  ;;  %112 = vmatpush.msra.mxu0 %v89_v21  ;;  %132 = vmatpush.msra.mxu1 %v89_v21  ;;  %v88_v22 = vld [vmem:[%s220_s3 + $0x10] sm:$0xff]  ;;  %v87_v23 = vld [vmem:[%s220_s3 + $0x8] sm:$0xff]  ;;  %v86_v24 = vld [vmem:[%s220_s3] sm:$0xff] }
   0x3   :  { %24 = vadd.xlane.f32.xlu0 %v23_v1  ;;  %v137_v39 = vld [vmem:[%s217_s1] ss:$0 sm:$0xff] }
   0x4   :  { %113 = vmatpush.msra.mxu0 %v88_v22  ;;  %133 = vmatpush.msra.mxu1 %v88_v22  ;;  %v138_v43 = vld [vmem:[%s218_s2] ss:$0 sm:$0xff] }
   0x5   :  { %v139_v53 = vld [vmem:[%s219_s4] ss:$0 sm:$0xff] }
   0x6   :  { %114 = vmatpush.msra.mxu0 %v87_v23  ;;  %134 = vmatpush.msra.mxu1 %v87_v23 }
   0x7   :  { %v141_v5 = vpop.eup %140 }
   0x8   :  { %v30_v6 = vmul.f32 32.0, %v141_v5  ;;  %vm34_vm1 = vweird.f32 %v141_v5  ;;  %115 = vmatpush.msra.mxu0 %v86_v24  ;;  %135 = vmatpush.msra.mxu1 %v86_v24 }
   0xa   :  { %v31_v7 = vsub.f32 1.0, %v30_v6 }
   0xb   :  { %27 = vadd.xlane.f32.xlu0 %v26_v3 }
   0xc   :  { %v32_v8 = vmul.f32 %v141_v5, %v31_v7 }
   0xe   :  { %v33_v9 = vadd.f32 %v141_v5, %v32_v8 }
  0x10   :  { %v35_v10 = vsel %vm34_vm1, %v141_v5, %v33_v9 }
  0x76   :  { %v25_v11 = vpop.xlane.xlu0 %24 }
  0x77   :  { %v36_v12 = vmul.f32 %v35_v10, %v25_v11 }
  0x79   :  { %v38_v13 = vsub.f32 %v20_v0, %v36_v12 }
  0x7b   :  { %v40_v14 = vmul.f32 %v38_v13, %v38_v13 }
  0x7d   :  { %v42_v15 = vsel %vm22_vm0, %v40_v14, 0.0 }
  0x7e   :  { %43 = vadd.xlane.f32.xlu1 %v42_v15  ;;  %v28_v16 = vpop.xlane.xlu0 %27 }
  0x7f   :  { %v37_v17 = vmul.f32 %v35_v10, %v28_v16 }
  0x81   :  { %v39_v18 = vsub.f32 %v21_v2, %v37_v17 }
  0x83   :  { %v41_v19 = vmul.f32 %v39_v18, %v39_v18 }
  0x85   :  { %v45_v20 = vsel %vm22_vm0, %v41_v19, 0.0 }
  0x86   :  { %46 = vadd.xlane.f32.xlu1 %v45_v20 }
  0xf1   :  { %v44_v25 = vpop.xlane.xlu1 %43 }
  0xf2   :  { %v48_v26 = vmul.f32 %v44_v25, %v35_v10 }
  0xf4   :  { %v50_v27 = vadd.f32 1e-05, %v48_v26 }
  0xf6   :  { %142 = vrsqrt.f32 %v50_v27  ;;  %vm58_vm3 = vweird.f32 %v50_v27 }
  0xf9   :  { %v47_v28 = vpop.xlane.xlu1 %46 }
  0xfa   :  { %v49_v29 = vmul.f32 %v47_v28, %v35_v10 }
  0xfc   :  { %v143_v30 = vpop.eup %142  ;;  %v51_v31 = vadd.f32 1e-05, %v49_v29 }
  0xfd   :  { %v53_v32 = vmul.f32 %v143_v30, %v50_v27  ;;  %vm59_vm2 = vweird.f32 %v143_v30 }
  0xfe   :  { %144 = vrsqrt.f32 %v51_v31  ;;  %vm60_vm4 = vmor %vm58_vm3, %vm59_vm2  ;;  %vm68_vm6 = vweird.f32 %v51_v31 }
  0xff   :  { %v54_v33 = vmul.f32 %v143_v30, %v53_v32 }
 0x101   :  { %v55_v34 = vmul.f32 0.5, %v54_v33 }
 0x103   :  { %v56_v35 = vsub.f32 1.5, %v55_v34 }
 0x104   :  { %v145_v36 = vpop.eup %144 }
 0x105   :  { %v57_v37 = vmul.f32 %v143_v30, %v56_v35  ;;  %v63_v38 = vmul.f32 %v145_v36, %v51_v31  ;;  %vm69_vm5 = vweird.f32 %v145_v36 }
 0x106   :  { %vm70_vm7 = vmor %vm68_vm6, %vm69_vm5 }
 0x107   :  { %v61_v40 = vsel %vm60_vm4, %v143_v30, %v57_v37  ;;  %v64_v41 = vmul.f32 %v145_v36, %v63_v38 }
 0x108   :  { %v72_v42 = vmul.f32 %v61_v40, %v38_v13 }
 0x109   :  { %v65_v44 = vmul.f32 0.5, %v64_v41 }
 0x10a   :  { %v78_v45 = vmul.f32 %v137_v39, %v72_v42 }
 0x10b   :  { %v66_v46 = vsub.f32 1.5, %v65_v44 }
 0x10c   :  { %v84_v47 = vadd.f32 %v138_v43, %v78_v45 }
 0x10d   :  { %v67_v48 = vmul.f32 %v145_v36, %v66_v46 }
 0x10e   :  { %130 = vmatmul.msk.f32.vlgmr.msra.gmra.mxu0 %vm22_vm0, %v84_v47 }
 0x10f   :  { %v71_v49 = vsel %vm70_vm7, %v145_v36, %v67_v48 }
 0x110   :  { %v73_v50 = vmul.f32 %v71_v49, %v39_v18 }
 0x112   :  { %v79_v51 = vmul.f32 %v137_v39, %v73_v50 }
 0x114   :  { %v85_v52 = vadd.f32 %v138_v43, %v79_v51 }
 0x116   :  { %131 = vmatmul.msk.f32.vlgmr.msra.gmra.mxu1 %vm22_vm0, %v85_v52 }
 0x18b   :  { %v117_v54 = vpop.f32.mrf.mxu0 }
 0x18c   :  { %v118_v55 = vadd.f32 %v139_v53, %v117_v54 }
 0x18e   :  { %124 = vst.msk [vmem:[%s221_s5] sm:$0xff] %vm123_vm8, %v118_v55 }
 0x193   :  { %v120_v56 = vpop.f32.mrf.mxu1 }
 0x194   :  { %v121_v57 = vadd.f32 %v139_v53, %v120_v56 }
 0x196   :  { %125 = vst.msk [vmem:[%s221_s5 + $0x8] sm:$0xff] %vm123_vm8, %v121_v57 }

// kernel: transformer_forward.10
= control target key start
LH: loop header
LB: loop body
LE: loop exit
PB: predicated region body
PF: predicated region fallthrough
CT: control target
= control target key end

     0   :  { %s1037_s24 = smov 0   ;;  %s1039_s25 = smov 0   ;;  %s1124_s0 = inlined_call_operand.vmem [shape: f32[3,4,2,8,8], index: 0, kind: input, shape index: {}, may-alias: {0,1,2}]   ;;  %s1125_s1 = inlined_call_operand.vmem [shape: f32[3,4,2,8,8], index: 1, kind: input, shape index: {}, may-alias: {0,1,2}]   ;;  %s1126_s2 = inlined_call_operand.vmem [shape: f32[3,4,2,8,8], index: 2, kind: input, shape index: {}, may-alias: {0,1,2}]   ;;  %s1127_s3 = inlined_call_operand.vmem [shape: f32[8,8], index: 3, kind: input, shape index: {}, may-alias: {3,5}]   ;;  %s1128_s4 = inlined_call_operand.vmem [shape: f32[8,8], index: 4, kind: input, shape index: {}, may-alias: {4,6}]   ;;  %s1129_s5 = inlined_call_operand.vmem [shape: f32[8,8], index: 5, kind: input, shape index: {}, may-alias: {3,5}]   ;;  %s1130_s6 = inlined_call_operand.vmem [shape: f32[8,8], index: 6, kind: input, shape index: {}, may-alias: {4,6}]   ;;  %s1131_s7 = inlined_call_operand.vmem [shape: f32[4,2,8,8], index: 7, kind: output, shape index: {}]  }
   0x1   :  { %s1041_s26 = smov 0   ;;  %s1043_s27 = smov 0  }
   0x2   :  { %s1045_s28 = smov 0  }
   0x3 LB: > { %s39_s29 = sadd.s32 1, %s982_s26  ;;  %s43_s30 = sadd.s32 1, %s986_s27  ;;  %s990_s28 = sphi %s1045_s28, %s17_s28   ;;  %s986_s27 = sphi %s1043_s27, %s1135_s27   ;;  %s982_s26 = sphi %s1041_s26, %s1134_s26   ;;  %s978_s25 = sphi %s1039_s25, %s1133_s25   ;;  %s974_s24 = sphi %s1037_s24, %s1132_s24  }
   0x4   : > { %p41_p0 = scmp.ge.s32.totalorder %s39_s29, 4  ;;  %p882_p1 = scmp.ge.s32.totalorder %s990_s28, 1 }
   0x5   : > { %p355_p2 = scmp.lt.s32.totalorder %s990_s28, 9 }
   0x6   : > { %s1137_s29 = smov (%p41_p0, %s39_s29), 0  ;;  %s1139_s30 = smov (!%p41_p0, %s43_s30), %s986_s27 }
   0x7   : > { %p356_p3 = pnand %p882_p1, %p355_p2  ;;  %p45_p4 = scmp.ge.s32.totalorder %s1139_s30, 2 }
   0x8   : > { %p439_p5 = scmp.lt.s32.totalorder (!%p356_p3), %s974_s24, 3  ;;  %p441_p6 = scmp.lt.s32.totalorder (!%p356_p3), %s978_s25, 1 }
   0x9   : > { %s1141_s30 = smov (%p45_p4, %s1139_s30), 0  ;;  %359 = sbr.rel (%p356_p3) target bundleno = 755 (0x2f3), region = 48 }
   0xa   : > { %s992_s17 = smov (!%p356_p3), 124   ;;  %s993_s18 = smov (!%p356_p3), 4  }
   0xe   : > { %s1143_s24 = smov (!%p439_p5, %s974_s24), 3  ;;  %s1145_s25 = smov (!%p441_p6, %s978_s25), 1  ;;  %vm508_vm0 = vcmask 64512   ;;  %v994_v4 = vmov 0.0   ;;  %v535_v7 = vld [vmem:[%s1129_s5] sm:$0xff]  ;;  %vm530_vm1 = vcmask 31744   ;;  %v578_v22 = vlaneseq }
   0xf   : > { %s883_s8 = sshll.u32 %s1143_s24, 1  ;;  %509 = vst.msk [vmem:[#allocation4] sm:$0xff] %vm508_vm0, %v994_v4  ;;  %v547_v8 = vld [vmem:[%s1130_s6] sm:$0xff]  ;;  %vm505_vm2 = vcmask 7168   ;;  %v995_v21 = vmov -1e+30  }
  0x10   : > { %s447_s9 = sadd.s32 %s883_s8, %s1145_s25  ;;  %v532_v10 = vld [vmem:[%s1128_s4] sm:$0xff]  ;;  %506 = vst.msk [vmem:[#allocation2] sm:$0xff] %vm505_vm2, %v995_v21  ;;  %v579_v23 = vshrl.u32 %v578_v22, 7  ;;  %v583_v24 = vand.u32 127, %v578_v22  ;;  %v996_v29 = vmov 0  }
  0x11   : > { %s1067_s10 = sshll.u32 %s447_s9, 3  ;;  %v519_v13 = vld [vmem:[%s1127_s3] sm:$0xff]  ;;  %507 = vst.msk [vmem:[#allocation3] sm:$0xff] %vm505_vm2, %v994_v4  ;;  %943 = vset.pattern.permute.xlu2 %v996_v29  ;;  %944 = vset.pattern.permute.xlu1 %v996_v29 }
  0x12   : > { %s757_s13 = scalar_lea.vmem %s1125_s1, %s1067_s10  ;;  %s449_s16 = scalar_lea.vmem %s1124_s0, %s1067_s10  ;;  %vm586_vm3 = vcmp.ge.s32.totalorder %v579_v23, %v583_v24  ;;  %945 = vset.pattern.permute.xlu0 %v996_v29 }
  0x13   : > { %v891_v0 = vld [vmem:[%s757_s13 + $0x40] sm:$0xff]  ;;  %s763_s12 = scalar_lea.vmem %s1126_s2, %s1067_s10  ;;  %s500_s15 = scalar_lea.vmem %s1131_s7, %s1067_s10 }
  0x14   : > { %v517_v1 = vld [vmem:[%s449_s16] sm:$0xff]  ;;  %v537_v2 = vsub.f32 0.0, %v891_v0  ;;  %v536_v12 = vmul.f32 %v891_v0, %v535_v7 }
  0x15   : > { %v521_v3 = vsub.f32 0.0, %v517_v1  ;;  %v520_v18 = vmul.f32 %v519_v13, %v517_v1  ;;  %v894_v36 = vld [vmem:[%s763_s12 + $0x80] sm:$0xff] }
  0x16   : > { %539 = vrot.lane.b32.xlu0 %v537_v2, %s992_s17  ;;  %638 = vmatpush.msra.mxu1 %v894_v36  ;;  %v612_v46 = vld [vmem:[#allocation4] sm:$0xff] }
  0x17   : > { %523 = vrot.lane.b32.xlu1 %v521_v3, %s992_s17  ;;  %v588_v30 = vld [vmem:[#allocation2] sm:$0xff] }
  0x18   : > { %v604_v42 = vld [vmem:[#allocation3] sm:$0xff] }
  0x1e   : > { %543 = vrot.lane.b32.xlu0 %v891_v0, %s993_s18 }
  0x1f   : > { %527 = vrot.lane.b32.xlu1 %v517_v1, %s993_s18 }
  0x88   : > { %v540_v5 = vpop.permute.xlu0 %539 }
  0x89   : > { %v524_v6 = vpop.permute.xlu1 %523 }
  0x90   : > { %v544_v9 = vpop.permute.xlu0 %543 }
  0x91   : > { %v528_v11 = vpop.permute.xlu1 %527  ;;  %v546_v14 = vsel %vm530_vm1, %v540_v5, %v544_v9 }
  0x92   : > { %v531_v15 = vsel %vm530_vm1, %v524_v6, %v528_v11  ;;  %v548_v16 = vmul.f32 %v547_v8, %v546_v14 }
  0x93   : > { %v533_v17 = vmul.f32 %v532_v10, %v531_v15 }
  0x94   : > { %v549_v19 = vadd.f32 %v548_v16, %v536_v12 }
  0x95   : > { %v534_v20 = vadd.f32 %v533_v17, %v520_v18 }
  0x96   : > { %892 = vmatpush.xpose.msk.msra.mxu0 %vm508_vm0, %v549_v19 }
  0x99   : > { %893 = vmatmul.msk.f32.vlgmr.msra.gmra.mxu0 %vm508_vm0, %v534_v20 }
 0x116   : > { %v574_v25 = vpop.f32.mrf.mxu0 }
 0x117   : > { %v577_v26 = vmul.f32 0.35355338, %v574_v25 }
 0x119   : > { %v587_v27 = vsel %vm586_vm3, %v577_v26, -1e+30 }
 0x11a   : > { %v589_v28 = vsel %vm508_vm0, %v587_v27, -inf }
 0x11b   : > { %590 = vmax.xlane.f32.xlu2 %v589_v28 }
 0x18e   : > { %v591_v31 = vpop.xlane.xlu2 %590 }
 0x18f   : > { %v592_v32 = vmax.f32 %v588_v30, %v591_v31 }
 0x191   : > { %v593_v33 = vsub.f32 %v588_v30, %v592_v32  ;;  %645 = vst.msk [vmem:[#allocation2] sm:$0xff] %vm505_vm2, %v592_v32  ;;  %598 = vperm.xlu2 %943, %v592_v32  }
 0x193   : > { %v594_v34 = vmul.f32 1.442695, %v593_v33 }
 0x195   : > { %946 = vpow2.f32 %v594_v34 }
 0x19b   : > { %v947_v35 = vpop.eup %946 }
 0x19c   : > { %615 = vperm.xlu1 %944, %v947_v35   ;;  %v605_v43 = vmul.f32 %v947_v35, %v604_v42 }
 0x1eb   : > { %v599_v37 = vpop.permute.xlu2 %598 }
 0x1ec   : > { %v601_v38 = vsub.f32 %v587_v27, %v599_v37 }
 0x1ee   : > { %v602_v39 = vmul.f32 1.442695, %v601_v38 }
 0x1f0   : > { %948 = vpow2.f32 %v602_v39 }
 0x1f6   : > { %v949_v40 = vpop.eup %948 }
 0x1f7   : > { %895 = vmatmul.msk.f32.vlgmr.msra.gmra.mxu1 %vm508_vm0, %v949_v40  ;;  %v606_v41 = vsel %vm508_vm0, %v949_v40, 0.0 }
 0x1f8   : > { %607 = vadd.xlane.f32.xlu0 %v606_v41 }
 0x20e   : > { %v616_v47 = vpop.permute.xlu1 %615 }
 0x20f   : > { %v618_v48 = vmul.f32 %v616_v47, %v612_v46 }
 0x26b   : > { %v608_v44 = vpop.xlane.xlu0 %607 }
 0x26c   : > { %v609_v45 = vadd.f32 %v608_v44, %v605_v43 }
 0x26e   : > { %611 = vst.msk [vmem:[#allocation3] sm:$0xff] %vm505_vm2, %v609_v45 }
 0x274   : > { %v640_v49 = vpop.f32.mrf.mxu1 }
 0x275   : > { %v643_v50 = vadd.f32 %v640_v49, %v618_v48  ;;  %v649_v51 = vld [vmem:[#allocation3] sm:$0xff] }
 0x276   : > { %950 = vrcp.f32 %v649_v51 }
 0x277   : > { %644 = vst.msk [vmem:[#allocation4] sm:$0xff] %vm508_vm0, %v643_v50 }
 0x27c   : > { %v951_v52 = vpop.eup %950 }
 0x27d   : > { %654 = vperm.xlu1 %944, %v951_v52  }
 0x27e   : > { %v650_v53 = vld [vmem:[#allocation4] sm:$0xff] }
 0x2ef   : > { %v655_v54 = vpop.permute.xlu1 %654 }
 0x2f0   : > { %v657_v55 = vmul.f32 %v655_v54, %v650_v53 }
 0x2f2   : > { %659 = vst.msk [vmem:[%s500_s15] sm:$0xff] %vm508_vm0, %v657_v55 }
 0x2f3 PF: > { %s17_s28 = sadd.s32 1, %s990_s28   ;;  %s1132_s24 = smov %s982_s26 }
 0x2f4   : > { %p14_p7 = scmp.ge.s32.totalorder %s17_s28, 10   ;;  %s1133_s25 = smov %s986_s27 }
 0x2f5   : > { %s1134_s26 = smov %s1137_s29  ;;  %s1135_s27 = smov %s1141_s30 }
 0x2f6   :  { %16 = sbr.rel (!%p14_p7) target bundleno = 3 (0x3), region = 108 }

// kernel: transformer_forward.12
= control target key start
LH: loop header
LB: loop body
LE: loop exit
PB: predicated region body
PF: predicated region fallthrough
CT: control target
= control target key end

     0   :  { %vm30_vm0 = vcmask 261120   ;;  %v326_v4 = vmov 32.0   ;;  %s504_s0 = inlined_call_operand.vmem [shape: f32[16,32], index: 0, kind: input, shape index: {}]   ;;  %s505_s1 = inlined_call_operand.vmem [shape: f32[1,32], index: 1, kind: input, shape index: {}]   ;;  %s506_s2 = inlined_call_operand.vmem [shape: f32[1,32], index: 2, kind: input, shape index: {}]   ;;  %s507_s4 = inlined_call_operand.vmem [shape: f32[1,128], index: 4, kind: input, shape index: {}]   ;;  %s508_s3 = inlined_call_operand.vmem [shape: f32[32,128], index: 3, kind: input, shape index: {}]   ;;  %s509_s6 = inlined_call_operand.vmem [shape: f32[1,32], index: 6, kind: input, shape index: {}]   ;;  %s510_s5 = inlined_call_operand.vmem [shape: f32[128,32], index: 5, kind: input, shape index: {}]   ;;  %s511_s7 = inlined_call_operand.vmem [shape: f32[16,32], index: 7, kind: output, shape index: {}]  }
   0x1   :  { %v371_v0 = vld [vmem:[%s504_s0] sm:$0xff]  ;;  %v378_v2 = vld [vmem:[%s504_s0 + $0x8] sm:$0xff]  ;;  %316 = vrcp.f32 %v326_v4  ;;  %v102_v21 = vld [vmem:[%s508_s3 + $0x18] sm:$0xff] }
   0x2   :  { %v36_v1 = vsel %vm30_vm0, %v371_v0, 0.0  ;;  %v39_v3 = vsel %vm30_vm0, %v378_v2, 0.0  ;;  %125 = vmatpush.msra.mxu0 %v102_v21  ;;  %v101_v22 = vld [vmem:[%s508_s3 + $0x10] sm:$0xff]  ;;  %v100_v23 = vld [vmem:[%s508_s3 + $0x8] sm:$0xff]  ;;  %v99_v24 = vld [vmem:[%s508_s3] sm:$0xff] }
   0x3   :  { %37 = vadd.xlane.f32.xlu0 %v36_v1  ;;  %v312_v39 = vld [vmem:[%s505_s1] ss:$0 sm:$0xff]  ;;  %v241_v53 = vld [vmem:[%s510_s5 + $0x78] sm:$0xff]  ;;  %v240_v54 = vld [vmem:[%s510_s5 + $0x70] sm:$0xff] }
   0x4   :  { %126 = vmatpush.msra.mxu0 %v101_v22  ;;  %v313_v43 = vld [vmem:[%s506_s2] ss:$0 sm:$0xff]  ;;  %242 = vmatpush.msra.mxu1 %v241_v53  ;;  %v239_v55 = vld [vmem:[%s510_s5 + $0x68] sm:$0xff]  ;;  %v237_v58 = vld [vmem:[%s510_s5 + $0x58] sm:$0xff] }
   0x5   :  { %294 = vmatpush.msra.mxu2 %v241_v53  ;;  %v238_v56 = vld [vmem:[%s510_s5 + $0x60] sm:$0xff]  ;;  %v236_v60 = vld [vmem:[%s510_s5 + $0x50] sm:$0xff]  ;;  %v235_v62 = vld [vmem:[%s510_s5 + $0x48] sm:$0xff] }
   0x6   :  { %127 = vmatpush.msra.mxu0 %v100_v23  ;;  %243 = vmatpush.msra.mxu1 %v240_v54  ;;  %v314_v57 = vld [vmem:[%s507_s4] ss:$0 sm:$0xff]  ;;  %v233_v4 = vld [vmem:[%s510_s5 + $0x38] sm:$0xff]  ;;  %v227_v22 = vld [vmem:[%s510_s5 + $0x8] sm:$0xff] }
   0x7   :  { %v317_v5 = vpop.eup %316  ;;  %295 = vmatpush.msra.mxu2 %v240_v54  ;;  %v234_v1 = vld [vmem:[%s510_s5 + $0x40] sm:$0xff] }
   0x8   :  { %v43_v6 = vmul.f32 32.0, %v317_v5  ;;  %vm47_vm1 = vweird.f32 %v317_v5  ;;  %128 = vmatpush.msra.mxu0 %v99_v24  ;;  %244 = vmatpush.msra.mxu1 %v239_v55 }
   0x9   :  { %296 = vmatpush.msra.mxu2 %v239_v55 }
   0xa   :  { %v44_v7 = vsub.f32 1.0, %v43_v6  ;;  %245 = vmatpush.msra.mxu1 %v238_v56 }
   0xb   :  { %40 = vadd.xlane.f32.xlu0 %v39_v3  ;;  %297 = vmatpush.msra.mxu2 %v238_v56 }
   0xc   :  { %v45_v8 = vmul.f32 %v317_v5, %v44_v7  ;;  %246 = vmatpush.msra.mxu1 %v237_v58 }
   0xd   :  { %298 = vmatpush.msra.mxu2 %v237_v58 }
   0xe   :  { %v46_v9 = vadd.f32 %v317_v5, %v45_v8  ;;  %247 = vmatpush.msra.mxu1 %v236_v60  ;;  %v231_v8 = vld [vmem:[%s510_s5 + $0x28] sm:$0xff] }
   0xf   :  { %299 = vmatpush.msra.mxu2 %v236_v60 }
  0x10   :  { %v48_v10 = vsel %vm47_vm1, %v317_v5, %v46_v9  ;;  %248 = vmatpush.msra.mxu1 %v235_v62  ;;  %v232_v5 = vld [vmem:[%s510_s5 + $0x30] sm:$0xff] }
  0x11   :  { %300 = vmatpush.msra.mxu2 %v235_v62 }
  0x12   :  { %249 = vmatpush.msra.mxu1 %v234_v1 }
  0x13   :  { %301 = vmatpush.msra.mxu2 %v234_v1 }
  0x14   :  { %250 = vmatpush.msra.mxu1 %v233_v4 }
  0x15   :  { %302 = vmatpush.msra.mxu2 %v233_v4 }
  0x16   :  { %251 = vmatpush.msra.mxu1 %v232_v5 }
  0x17   :  { %303 = vmatpush.msra.mxu2 %v232_v5 }
  0x18   :  { %252 = vmatpush.msra.mxu1 %v231_v8 }
  0x19   :  { %304 = vmatpush.msra.mxu2 %v231_v8 }
  0x76   :  { %v38_v11 = vpop.xlane.xlu0 %37 }
  0x77   :  { %v49_v12 = vmul.f32 %v48_v10, %v38_v11 }
  0x79   :  { %v51_v13 = vsub.f32 %v371_v0, %v49_v12  ;;  %v230_v12 = vld [vmem:[%s510_s5 + $0x20] sm:$0xff] }
  0x7a   :  { %253 = vmatpush.msra.mxu1 %v230_v12  ;;  %305 = vmatpush.msra.mxu2 %v230_v12 }
  0x7b   :  { %v53_v14 = vmul.f32 %v51_v13, %v51_v13 }
  0x7d   :  { %v55_v15 = vsel %vm30_vm0, %v53_v14, 0.0 }
  0x7e   :  { %56 = vadd.xlane.f32.xlu1 %v55_v15  ;;  %v41_v16 = vpop.xlane.xlu0 %40  ;;  %v229_v15 = vld [vmem:[%s510_s5 + $0x18] sm:$0xff] }
  0x7f   :  { %v50_v17 = vmul.f32 %v48_v10, %v41_v16  ;;  %254 = vmatpush.msra.mxu1 %v229_v15  ;;  %306 = vmatpush.msra.mxu2 %v229_v15 }
  0x81   :  { %v52_v18 = vsub.f32 %v378_v2, %v50_v17 }
  0x83   :  { %v54_v19 = vmul.f32 %v52_v18, %v52_v18 }
  0x85   :  { %v58_v20 = vsel %vm30_vm0, %v54_v19, 0.0  ;;  %v228_v19 = vld [vmem:[%s510_s5 + $0x10] sm:$0xff] }
  0x86   :  { %59 = vadd.xlane.f32.xlu1 %v58_v20  ;;  %255 = vmatpush.msra.mxu1 %v228_v19 }
  0x87   :  { %307 = vmatpush.msra.mxu2 %v228_v19 }
  0x88   :  { %256 = vmatpush.msra.mxu1 %v227_v22 }
  0x89   :  { %308 = vmatpush.msra.mxu2 %v227_v22 }
  0xf1   :  { %v57_v25 = vpop.xlane.xlu1 %56 }
  0xf2   :  { %v61_v26 = vmul.f32 %v57_v25, %v48_v10 }
  0xf4   :  { %v63_v27 = vadd.f32 1e-05, %v61_v26 }
  0xf6   :  { %318 = vrsqrt.f32 %v63_v27  ;;  %vm71_vm3 = vweird.f32 %v63_v27 }
  0xf9   :  { %v60_v28 = vpop.xlane.xlu1 %59 }
  0xfa   :  { %v62_v29 = vmul.f32 %v60_v28, %v48_v10 }
  0xfc   :  { %v319_v30 = vpop.eup %318  ;;  %v64_v31 = vadd.f32 1e-05, %v62_v29 }
  0xfd   :  { %v66_v32 = vmul.f32 %v319_v30, %v63_v27  ;;  %vm72_vm2 = vweird.f32 %v319_v30  ;;  %v226_v27 = vld [vmem:[%s510_s5] sm:$0xff] }
  0xfe   :  { %320 = vrsqrt.f32 %v64_v31  ;;  %vm73_vm4 = vmor %vm71_vm3, %vm72_vm2  ;;  %vm81_vm6 = vweird.f32 %v64_v31  ;;  %257 = vmatpush.msra.mxu1 %v226_v27  ;;  %309 = vmatpush.msra.mxu2 %v226_v27 }
  0xff   :  { %v67_v33 = vmul.f32 %v319_v30, %v66_v32 }
 0x101   :  { %v68_v34 = vmul.f32 0.5, %v67_v33 }
 0x103   :  { %v69_v35 = vsub.f32 1.5, %v68_v34 }
 0x104   :  { %v321_v36 = vpop.eup %320 }
 0x105   :  { %v70_v37 = vmul.f32 %v319_v30, %v69_v35  ;;  %v76_v38 = vmul.f32 %v321_v36, %v64_v31  ;;  %vm82_vm5 = vweird.f32 %v321_v36 }
 0x106   :  { %vm83_vm7 = vmor %vm81_vm6, %vm82_vm5 }
 0x107   :  { %v74_v40 = vsel %vm73_vm4, %v319_v30, %v70_v37  ;;  %v77_v41 = vmul.f32 %v321_v36, %v76_v38 }
 0x108   :  { %v85_v42 = vmul.f32 %v74_v40, %v51_v13 }
 0x109   :  { %v78_v44 = vmul.f32 0.5, %v77_v41 }
 0x10a   :  { %v91_v45 = vmul.f32 %v312_v39, %v85_v42 }
 0x10b   :  { %v79_v46 = vsub.f32 1.5, %v78_v44 }
 0x10c   :  { %v97_v47 = vadd.f32 %v313_v43, %v91_v45 }
 0x10d   :  { %v80_v48 = vmul.f32 %v321_v36, %v79_v46 }
 0x10e   :  { %290 = vmatmul.msk.f32.vlgmr.msra.gmra.mxu0 %vm30_vm0, %v97_v47 }
 0x10f   :  { %v84_v49 = vsel %vm83_vm7, %v321_v36, %v80_v48 }
 0x110   :  { %v86_v50 = vmul.f32 %v84_v49, %v52_v18  ;;  %v327_v49 = vmov 0.0  }
 0x111   :  { %31 = vst.msk [vmem:[#allocation2] sm:$0xff] %vm30_vm0, %v327_v49 }
 0x112   :  { %v92_v51 = vmul.f32 %v312_v39, %v86_v50  ;;  %32 = vst.msk [vmem:[#allocation2 + $0x8] sm:$0xff] %vm30_vm0, %v327_v49 }
 0x114   :  { %v98_v52 = vadd.f32 %v313_v43, %v92_v51 }
 0x116   :  { %291 = vmatmul.msk.f32.gmra.mxu0 %vm30_vm0, %v98_v52 }
 0x18b   :  { %v130_v59 = vpop.f32.mrf.mxu0 }
 0x18c   :  { %v427_v61 = vadd.f32 %v314_v57, %v130_v59 }
 0x18e   :  { %v433_v63 = vmul.f32 0.70710677, %v427_v61 }
 0x190   :  { %v140_v3 = vmul.f32 %v433_v63, %v433_v63 }
 0x192   :  { %v446_v6 = vmin.f32 %v140_v3, 16.0 }
 0x193   :  { %v133_v7 = vpop.f32.mrf.mxu0 }
 0x194   :  { %v142_v9 = vmul.f32 2.1237322e-06, %v446_v6  ;;  %v452_v10 = vadd.f32 %v314_v57, %v133_v7  ;;  %v153_v11 = vmul.f32 3.8918573e-05, %v446_v6 }
 0x196   :  { %v143_v13 = vadd.f32 0.00028619796, %v142_v9  ;;  %v459_v14 = vmul.f32 0.70710677, %v452_v10  ;;  %v154_v16 = vadd.f32 0.001143296, %v153_v11 }
 0x198   :  { %v144_v17 = vmul.f32 %v143_v13, %v446_v6  ;;  %v180_v18 = vmul.f32 %v459_v14, %v459_v14  ;;  %v155_v20 = vmul.f32 %v154_v16, %v446_v6 }
 0x19a   :  { %v181_v21 = vmin.f32 %v180_v18, 16.0  ;;  %v156_v23 = vadd.f32 0.014752088, %v155_v20  ;;  %v145_v24 = vadd.f32 0.0036580483, %v144_v17 }
 0x19c   :  { %v182_v25 = vmul.f32 2.1237322e-06, %v181_v21  ;;  %v193_v26 = vmul.f32 3.8918573e-05, %v181_v21  ;;  %v157_v28 = vmul.f32 %v156_v23, %v446_v6  ;;  %v146_v32 = vmul.f32 %v145_v24, %v446_v6 }
 0x19e   :  { %v183_v29 = vadd.f32 0.00028619796, %v182_v25  ;;  %v194_v30 = vadd.f32 0.001143296, %v193_v26  ;;  %v158_v31 = vadd.f32 0.112945676, %v157_v28 }
 0x19f   :  { %v147_v39 = vadd.f32 0.05243302, %v146_v32  ;;  %v224_v32 = vld [vmem:[#allocation2] sm:$0xff] }
 0x1a0   :  { %v184_v33 = vmul.f32 %v183_v29, %v181_v21  ;;  %v195_v34 = vmul.f32 %v194_v30, %v181_v21  ;;  %v159_v35 = vmul.f32 %v158_v31, %v446_v6  ;;  %v137_v29 = vmul.f32 0.5, %v452_v10 }
 0x1a1   :  { %v148_v45 = vmul.f32 %v147_v39, %v446_v6 }
 0x1a2   :  { %v196_v36 = vadd.f32 0.014752088, %v195_v34  ;;  %v185_v37 = vadd.f32 0.0036580483, %v184_v33  ;;  %v160_v38 = vadd.f32 0.4994258, %v159_v35 }
 0x1a3   :  { %v149_v50 = vadd.f32 0.18741608, %v148_v45 }
 0x1a4   :  { %v197_v40 = vmul.f32 %v196_v36, %v181_v21  ;;  %v161_v41 = vmul.f32 %v160_v38, %v446_v6  ;;  %v186_v43 = vmul.f32 %v185_v37, %v181_v21  ;;  %v225_v36 = vld [vmem:[#allocation2 + $0x8] sm:$0xff] }
 0x1a5   :  { %v150_v55 = vmul.f32 %v149_v50, %v446_v6 }
 0x1a6   :  { %v198_v42 = vadd.f32 0.112945676, %v197_v40  ;;  %v162_v44 = vadd.f32 1.0, %v161_v41  ;;  %v187_v48 = vadd.f32 0.05243302, %v186_v43 }
 0x1a7   :  { %v151_v60 = vadd.f32 1.1283791, %v150_v55 }
 0x1a8   :  { %v199_v46 = vmul.f32 %v198_v42, %v181_v21  ;;  %322 = vrcp.f32 %v162_v44  ;;  %v188_v54 = vmul.f32 %v187_v48, %v181_v21  ;;  %v174_v59 = vand.u32 2147483648, %v162_v44 }
 0x1a9   :  { %v172_v1 = vand.u32 2147483647, %v162_v44  ;;  %vm168_vm9 = vweird.f32 %v162_v44  ;;  %v152_v9 = vmul.f32 %v151_v60, %v433_v63 }
 0x1aa   :  { %v200_v47 = vadd.f32 0.4994258, %v199_v46  ;;  %v189_v58 = vadd.f32 0.18741608, %v188_v54  ;;  %v175_v7 = vor.u32 1.1754944e-38, %v174_v59 }
 0x1ab   :  { %vm173_vm11 = vcmp.eq.f32.partialorder %v172_v1, 8.507059e+37 }
 0x1ac   :  { %v201_v51 = vmul.f32 %v200_v47, %v181_v21  ;;  %v190_v5 = vmul.f32 %v189_v58, %v181_v21  ;;  %v136_v21 = vmul.f32 0.5, %v427_v61 }
 0x1ae   :  { %v202_v52 = vadd.f32 1.0, %v201_v51  ;;  %v323_v53 = vpop.eup %322  ;;  %v191_v16 = vadd.f32 1.1283791, %v190_v5 }
 0x1af   :  { %v164_v56 = vmul.f32 %v323_v53, %v162_v44  ;;  %vm169_vm8 = vweird.f32 %v323_v53 }
 0x1b0   :  { %324 = vrcp.f32 %v202_v52  ;;  %vm170_vm10 = vmor %vm168_vm9, %vm169_vm8  ;;  %v214_v15 = vand.u32 2147483648, %v202_v52  ;;  %v212_v18 = vand.u32 2147483647, %v202_v52  ;;  %vm208_vm13 = vweird.f32 %v202_v52 }
 0x1b1   :  { %v165_v57 = vsub.f32 1.0, %v164_v56  ;;  %v192_v63 = vmul.f32 %v191_v16, %v459_v14  ;;  %v315_v14 = vld [vmem:[%s509_s6] ss:$0 sm:$0xff] }
 0x1b2   :  { %v215_v23 = vor.u32 1.1754944e-38, %v214_v15  ;;  %vm213_vm15 = vcmp.eq.f32.partialorder %v212_v18, 8.507059e+37 }
 0x1b3   :  { %v166_v62 = vmul.f32 %v323_v53, %v165_v57 }
 0x1b5   :  { %v167_v4 = vadd.f32 %v323_v53, %v166_v62 }
 0x1b6   :  { %v325_v3 = vpop.eup %324 }
 0x1b7   :  { %v204_v8 = vmul.f32 %v325_v3, %v202_v52  ;;  %v171_v11 = vsel %vm170_vm10, %v323_v53, %v167_v4  ;;  %vm209_vm12 = vweird.f32 %v325_v3 }
 0x1b8   :  { %v176_v6 = vsel %vm173_vm11, %v175_v7, %v171_v11  ;;  %vm210_vm14 = vmor %vm208_vm13, %vm209_vm12 }
 0x1b9   :  { %v205_v12 = vsub.f32 1.0, %v204_v8  ;;  %v177_v13 = vmul.f32 %v176_v6, %v152_v9 }
 0x1bb   :  { %v206_v17 = vmul.f32 %v325_v3, %v205_v12  ;;  %v292_v19 = vclamps-f32 %v177_v13, 1.0 }
 0x1bd   :  { %v207_v20 = vadd.f32 %v325_v3, %v206_v17  ;;  %v220_v22 = vadd.f32 1.0, %v292_v19 }
 0x1bf   :  { %v211_v24 = vsel %vm210_vm14, %v325_v3, %v207_v20  ;;  %v222_v25 = vmul.f32 %v220_v22, %v136_v21 }
 0x1c0   :  { %v216_v26 = vsel %vm213_vm15, %v215_v23, %v211_v24 }
 0x1c1   :  { %v217_v27 = vmul.f32 %v216_v26, %v192_v63  ;;  %258 = vmatmul.f32.vlgmr.msra.gmra.mxu1 %v222_v25 }
 0x1c3   :  { %v293_v28 = vclamps-f32 %v217_v27, 1.0 }
 0x1c5   :  { %v221_v30 = vadd.f32 1.0, %v293_v28 }
 0x1c7   :  { %v223_v31 = vmul.f32 %v221_v30, %v137_v29 }
 0x1c9   :  { %261 = vmatmul.f32.vlgmr.msra.gmra.mxu2 %v223_v31 }
 0x23e   :  { %v259_v33 = vpop.f32.mrf.mxu1 }
 0x23f   :  { %v265_v61 = vadd.f32 %v259_v33, %v224_v32 }
 0x241   :  { %267 = vst.msk [vmem:[#allocation2] sm:$0xff] %vm30_vm0, %v265_v61 }
 0x248   :  { %v272_v34 = vld [vmem:[#allocation2] sm:$0xff] }
 0x249   :  { %v278_v35 = vadd.f32 %v315_v14, %v272_v34 }
 0x24b   :  { %v282_v37 = vadd.f32 %v278_v35, %v371_v0 }
 0x24c   :  { %v262_v38 = vpop.f32.mrf.mxu2 }
 0x24d   :  { %v266_v39 = vadd.f32 %v262_v38, %v225_v36  ;;  %284 = vst.msk [vmem:[%s511_s7] sm:$0xff] %vm30_vm0, %v282_v37 }
 0x24f   :  { %268 = vst.msk [vmem:[#allocation2 + $0x8] sm:$0xff] %vm30_vm0, %v266_v39 }
 0x256   :  { %v273_v10 = vld [vmem:[#allocation2 + $0x8] sm:$0xff] }
 0x257   :  { %v279_v40 = vadd.f32 %v315_v14, %v273_v10 }
 0x259   :  { %v283_v41 = vadd.f32 %v378_v2, %v279_v40 }
 0x25b   :  { %285 = vst.msk [vmem:[%s511_s7 + $0x8] sm:$0xff] %vm30_vm0, %v283_v41 }

// kernel: transformer_forward.17
= control target key start
LH: loop header
LB: loop body
LE: loop exit
PB: predicated region body
PF: predicated region fallthrough
CT: control target
= control target key end

     0   :  { %vm17_vm0 = vcmask 261120   ;;  %s184_s0 = inlined_call_operand.vmem [shape: f32[16,32], index: 0, kind: input, shape index: {}]   ;;  %s185_s1 = inlined_call_operand.vmem [shape: f32[1,32], index: 1, kind: input, shape index: {}]   ;;  %s186_s2 = inlined_call_operand.vmem [shape: f32[1,32], index: 2, kind: input, shape index: {}]   ;;  %s187_s3 = inlined_call_operand.hbm [shape: f32[16,32], index: 3, kind: output, shape index: {}]  }
   0x1   :  { %v15_v0 = vld [vmem:[%s184_s0] sm:$0xff] }
   0x2   :  { %v18_v1 = vsel %vm17_vm0, %v15_v0, 0.0 }
   0x3   :  { %8 = vsyncpa [#allocation3], 0  ;;  %19 = vadd.xlane.f32.xlu0 %v18_v1  ;;  %v16_v2 = vld [vmem:[%s184_s0 + $0x8] sm:$0xff]  ;;  %v139_v4 = vmov 32.0   ;;  %v105_v35 = vld [vmem:[%s185_s1] ss:$0 sm:$0xff] }
   0x4   :  { %v21_v3 = vsel %vm17_vm0, %v16_v2, 0.0  ;;  %107 = vrcp.f32 %v139_v4  ;;  %v106_v39 = vld [vmem:[%s186_s2] ss:$0 sm:$0xff]  ;;  %s140_s1 = smov [#allocation2]   ;;  %s89_s22 = sshll.u32 %s187_s3, 4  ;;  %s90_s22 = int_to_ptr.hbm [resolvable:$true] %s89_s22 }
   0x5   :  { %s87_s19 = sshll.u32 %s140_s1, 4  ;;  %s141_s2 = smov 128   ;;  %s88_s19 = int_to_ptr.vmem [resolvable:$true] %s87_s19 }
   0x6   :  { %s142_s23 = smov 8  }
   0xa   :  { %v108_v5 = vpop.eup %107 }
   0xb   :  { %22 = vadd.xlane.f32.xlu0 %v21_v3  ;;  %v25_v6 = vmul.f32 32.0, %v108_v5  ;;  %vm29_vm1 = vweird.f32 %v108_v5 }
   0xd   :  { %v26_v7 = vsub.f32 1.0, %v25_v6 }
   0xf   :  { %v27_v8 = vmul.f32 %v108_v5, %v26_v7 }
  0x11   :  { %v28_v9 = vadd.f32 %v108_v5, %v27_v8 }
  0x13   :  { %v30_v10 = vsel %vm29_vm1, %v108_v5, %v28_v9 }
  0x76   :  { %v20_v11 = vpop.xlane.xlu0 %19 }
  0x77   :  { %v31_v12 = vmul.f32 %v30_v10, %v20_v11 }
  0x79   :  { %v33_v13 = vsub.f32 %v15_v0, %v31_v12 }
  0x7b   :  { %v35_v14 = vmul.f32 %v33_v13, %v33_v13 }
  0x7d   :  { %v37_v15 = vsel %vm17_vm0, %v35_v14, 0.0 }
  0x7e   :  { %38 = vadd.xlane.f32.xlu1 %v37_v15  ;;  %v23_v16 = vpop.xlane.xlu0 %22 }
  0x7f   :  { %v32_v17 = vmul.f32 %v30_v10, %v23_v16 }
  0x81   :  { %v34_v18 = vsub.f32 %v16_v2, %v32_v17 }
  0x83   :  { %v36_v19 = vmul.f32 %v34_v18, %v34_v18 }
  0x85   :  { %v40_v20 = vsel %vm17_vm0, %v36_v19, 0.0 }
  0x86   :  { %41 = vadd.xlane.f32.xlu1 %v40_v20 }
  0xf1   :  { %v39_v21 = vpop.xlane.xlu1 %38 }
  0xf2   :  { %v43_v22 = vmul.f32 %v39_v21, %v30_v10 }
  0xf4   :  { %v45_v23 = vadd.f32 1e-05, %v43_v22 }
  0xf6   :  { %109 = vrsqrt.f32 %v45_v23  ;;  %vm53_vm3 = vweird.f32 %v45_v23 }
  0xf9   :  { %v42_v24 = vpop.xlane.xlu1 %41 }
  0xfa   :  { %v44_v25 = vmul.f32 %v42_v24, %v30_v10 }
  0xfc   :  { %v110_v26 = vpop.eup %109  ;;  %v46_v27 = vadd.f32 1e-05, %v44_v25 }
  0xfd   :  { %v48_v28 = vmul.f32 %v110_v26, %v45_v23  ;;  %vm54_vm2 = vweird.f32 %v110_v26 }
  0xfe   :  { %111 = vrsqrt.f32 %v46_v27  ;;  %vm55_vm4 = vmor %vm53_vm3, %vm54_vm2  ;;  %vm63_vm6 = vweird.f32 %v46_v27 }
  0xff   :  { %v49_v29 = vmul.f32 %v110_v26, %v48_v28 }
 0x101   :  { %v50_v30 = vmul.f32 0.5, %v49_v29 }
 0x103   :  { %v51_v31 = vsub.f32 1.5, %v50_v30 }
 0x104   :  { %v112_v32 = vpop.eup %111 }
 0x105   :  { %v52_v33 = vmul.f32 %v110_v26, %v51_v31  ;;  %v58_v34 = vmul.f32 %v112_v32, %v46_v27  ;;  %vm64_vm5 = vweird.f32 %v112_v32 }
 0x106   :  { %vm65_vm7 = vmor %vm63_vm6, %vm64_vm5 }
 0x107   :  { %v56_v36 = vsel %vm55_vm4, %v110_v26, %v52_v33  ;;  %v59_v37 = vmul.f32 %v112_v32, %v58_v34 }
 0x108   :  { %v67_v38 = vmul.f32 %v56_v36, %v33_v13 }
 0x109   :  { %v60_v40 = vmul.f32 0.5, %v59_v37 }
 0x10a   :  { %v73_v41 = vmul.f32 %v105_v35, %v67_v38 }
 0x10b   :  { %v61_v42 = vsub.f32 1.5, %v60_v40 }
 0x10c   :  { %v79_v43 = vadd.f32 %v106_v39, %v73_v41 }
 0x10d   :  { %v62_v44 = vmul.f32 %v112_v32, %v61_v42 }
 0x10e   :  { %81 = vst.msk [vmem:[#allocation2] sm:$0xff] %vm17_vm0, %v79_v43 }
 0x10f   :  { %v66_v45 = vsel %vm65_vm7, %v112_v32, %v62_v44 }
 0x110   :  { %v68_v46 = vmul.f32 %v66_v45, %v34_v18 }
 0x112   :  { %v74_v47 = vmul.f32 %v105_v35, %v68_v46 }
 0x114   :  { %v80_v48 = vadd.f32 %v106_v39, %v74_v47 }
 0x116   :  { %82 = vst.msk [vmem:[#allocation2 + $0x8] sm:$0xff] %vm17_vm0, %v80_v48 }
 0x117   :  { %95 = dma.vmem_to_hbm [thread:$0]  %s88_s19, 256, %s90_s22, [#allocation3], %s141_s2, %s141_s2, %s142_s23  }
 0x118   :  { %137 = dma.done.wait [#allocation3], 256  }
 0x119   :  { %138 = vsyncadd [#allocation3], 4294967040 }
 0x11a   :  { %100 = vsyncpa [#allocation3], 1 }

</bundles_post_ra>
